<compile_context>
chip_gen: v7x
topology: tpu7x:2x2x1
jax: 0.10.0
libtpu: 0.0.40
codegen_flags: <defaults>
</compile_context>

<pallas_src>
import functools

import jax
import jax.numpy as jnp
from jax.experimental import pallas as pl
from jax.experimental.pallas import tpu as pltpu

F32 = jnp.float32
BF16 = jnp.bfloat16
_BN_EPS = 1e-5

# Explicit scoped-VMEM budget (fits v7x's 64 MiB physical VMEM; demo uses ~1 MiB).
_COMPILER_PARAMS = pltpu.CompilerParams(vmem_limit_bytes=64 * 1024 * 1024)


def _round_up(x, m):
    return ((x + m - 1) // m) * m


# ----------------------------- in-kernel helpers ----------------------------

def _bn_train(x, gamma, beta, *, count, relu, mask=None):
    """Training-mode BatchNorm1d over `count` valid rows; one reduction pass
    (sum + sum-of-squares, biased variance, eps=1e-5). `mask` ([rows,1] of 0/1)
    excludes padded rows from the statistics."""
    xm = x if mask is None else x * mask
    s = jnp.sum(xm, axis=0, keepdims=True)
    ss = jnp.sum(xm * xm, axis=0, keepdims=True)
    mean = s * (1.0 / count)
    var = ss * (1.0 / count) - mean * mean          # E[x^2] - E[x]^2
    y = (x - mean) * jax.lax.rsqrt(var + _BN_EPS) * gamma + beta
    if relu:
        y = jnp.maximum(y, 0.0)
    return y


def _onehot(eq):
    # exact 0/1 f32 selection matrix from a boolean comparison
    return jnp.where(eq, 1.0, 0.0).astype(F32)


# ----------------------------- Pallas kernels -------------------------------

def _make_layer_kernel(*, n_pad, num_graphs, n_real, last_layer):
    """Fused GNN layer: VN broadcast-add -> GIN message passing (exact f32
    gather / scatter-sum via in-kernel one-hot MXU matmuls) -> MLP + BN(+ReLU)
    -> outer BN(+ReLU). Non-final layers additionally run the virtual-node
    update; the final layer fuses the sum-pool readout + prediction Linear."""
    B = num_graphs

    def kernel(eps_ref, bidc_ref, bidr_ref, nmask_ref, x_ref, vne_ref, ee_ref,
               srcc_ref, dstr_ref, cw1_ref, cw2_ref, cvec_ref, *rest):
        if last_layer:
            pw_ref, pb_ref, out_ref = rest
        else:
            vw1_ref, vw2_ref, vvec_ref, h_out, vne_out = rest

        nmask = nmask_ref[...]                      # [N,1] f32 valid-node mask
        vne = vne_ref[...]                          # [B,H] f32
        cvec = cvec_ref[...]                        # [6,H] packed vectors

        # Exact f32 selection matrices built in-kernel from int32 ids
        # (padding sentinel -1 -> all-zero row/column, contributes nothing).
        iota_g_row = jax.lax.broadcasted_iota(jnp.int32, (1, B), 1)
        iota_g_col = jax.lax.broadcasted_iota(jnp.int32, (B, 1), 0)
        iota_n_row = jax.lax.broadcasted_iota(jnp.int32, (1, n_pad), 1)
        iota_n_col = jax.lax.broadcasted_iota(jnp.int32, (n_pad, 1), 0)
        sel_n2g = _onehot(bidc_ref[...] == iota_g_row)   # [N,B] node -> its graph
        sel_g2n = _onehot(iota_g_col == bidr_ref[...])   # [B,N] graph -> its nodes
        sel_src = _onehot(srcc_ref[...] == iota_n_row)   # [E,N] edge -> src node
        sel_dst = _onehot(iota_n_col == dstr_ref[...])   # [N,E] node -> in-edges

        # h_list[layer] = h_list[layer] + vne[batch_id]   (exact f32 MXU "gather")
        hl = x_ref[...] + jnp.dot(sel_n2g, vne, preferred_element_type=F32)

        # --- GINConvRandom message passing (exact f32) ---
        x_src = jnp.dot(sel_src, hl, preferred_element_type=F32)     # x[src]  [E,H]
        msg = jnp.maximum(x_src + ee_ref[...], 0.0)                  # relu(x_u + e)
        agg = jnp.dot(sel_dst, msg, preferred_element_type=F32)      # seg-sum by dst
        pre = (1.0 + eps_ref[0]) * hl + agg

        # --- mlp: Linear -> BN -> ReLU -> Linear  (bf16 MXU, f32 acc, f32 VPU) ---
        h = jnp.dot(pre.astype(BF16), cw1_ref[...],
                    preferred_element_type=F32) + cvec[0:1]
        h = _bn_train(h, cvec[1:2], cvec[2:3], count=n_real, relu=True, mask=nmask)
        h = jnp.dot(h.astype(BF16), cw2_ref[...],
                    preferred_element_type=F32) + cvec[3:4]

        # outer per-layer BatchNorm (+ReLU except last layer); dropout p=0 -> id
        h = _bn_train(h, cvec[4:5], cvec[5:6], count=n_real,
                      relu=not last_layer, mask=nmask)
        h = h * nmask                               # keep padded rows clean

        if last_layer:
            # JK='last' -> fused readout: per-graph sum pooling + prediction Linear
            hg = jnp.dot(sel_g2n, h, preferred_element_type=F32)     # [B,H]
            out_ref[...] = jnp.dot(hg.astype(BF16), pw_ref[...],
                                   preferred_element_type=F32) + pb_ref[...]
        else:
            h_out[...] = h
            # virtual-node update: sum-pool(h_list[layer]) + vne -> 2x(Lin,BN,ReLU)
            vvec = vvec_ref[...]
            pooled = jnp.dot(sel_g2n, hl, preferred_element_type=F32) + vne
            v = jnp.dot(pooled.astype(BF16), vw1_ref[...],
                        preferred_element_type=F32) + vvec[0:1]
            v = _bn_train(v, vvec[1:2], vvec[2:3], count=B, relu=True)
            v = jnp.dot(v.astype(BF16), vw2_ref[...],
                        preferred_element_type=F32) + vvec[3:4]
            v = _bn_train(v, vvec[4:5], vvec[5:6], count=B, relu=True)
            vne_out[...] = v                        # dropout p=0 -> identity

    return kernel


# ----------------------------- Pallas wrappers ------------------------------

def _vmem():
    return pl.BlockSpec(memory_space=pltpu.MemorySpace.VMEM)


def _smem():
    return pl.BlockSpec(memory_space=pltpu.MemorySpace.SMEM)


def gin_vn_layer(x, vne, ee, src_col, dst_row, bid_col, bid_row, nmask,
                 conv_p, vn_p, pred_p, *, n_real, num_graphs, last_layer):
    n_pad, H = x.shape
    kern = _make_layer_kernel(n_pad=n_pad, num_graphs=num_graphs,
                              n_real=n_real, last_layer=last_layer)

    args = [conv_p["eps"],                 # 0  SMEM scalar
            bid_col, bid_row, nmask,       # 1-3
            x, vne,                        # 4-5  (aliased to outputs below)
            ee, src_col, dst_row,          # 6-8
            conv_p["w1"], conv_p["w2"], conv_p["vecs"]]   # 9-11

    if last_layer:
        args += [pred_p["w"], pred_p["b"]]
        out_shape = jax.ShapeDtypeStruct((num_graphs, pred_p["w"].shape[1]), F32)
        out_specs = _vmem()
        io_aliases = {}
    else:
        args += [vn_p["w1"], vn_p["w2"], vn_p["vecs"]]
        out_shape = (jax.ShapeDtypeStruct((n_pad, H), F32),
                     jax.ShapeDtypeStruct(vne.shape, F32))
        out_specs = (_vmem(), _vmem())
        io_aliases = {4: 0, 5: 1}          # x -> h_out, vne -> vne_out (no new HBM)

    in_specs = [_smem()] + [_vmem()] * (len(args) - 1)
    return pl.pallas_call(
        kern,
        out_shape=out_shape,
        in_specs=in_specs,
        out_specs=out_specs,
        input_output_aliases=io_aliases,
        compiler_params=_COMPILER_PARAMS,
    )(*args)


# ----------------------------- parameters -----------------------------------

def _dense_init(key, fan_in, fan_out):
    kw, kb = jax.random.split(key)
    lim = 1.0 / jnp.sqrt(fan_in)
    w = jax.random.uniform(kw, (fan_in, fan_out), F32, -lim, lim)
    b = jax.random.uniform(kb, (fan_out,), F32, -lim, lim)
    return w, b


def _emb_tables(key, vocabs, dim):
    keys = jax.random.split(key, len(vocabs))
    return [0.1 * jax.random.normal(k, (v, dim), F32) for k, v in zip(keys, vocabs)]


def init_params(key, num_layers, hidden_dim, random_vec_dim, num_tasks,
                atom_vocabs, bond_vocabs):
    H = hidden_dim
    small = H - random_vec_dim
    ones = jnp.ones((H,), F32)
    zeros = jnp.zeros((H,), F32)
    params = {}
    key, k = jax.random.split(key)
    params["atom_tables"] = _emb_tables(k, atom_vocabs, small)
    params["vn_emb"] = jnp.zeros((1, H), F32)        # nn.init.constant_(.., 0)

    convs, vn_mlps = [], []
    for _ in range(num_layers):
        key, k1, k2, k3 = jax.random.split(key, 4)
        w1, b1 = _dense_init(k1, H, H)
        w2, b2 = _dense_init(k2, H, H)
        convs.append({
            "bond_tables": _emb_tables(k3, bond_vocabs, small),
            "w1": w1.astype(BF16), "w2": w2.astype(BF16),   # bf16 MXU weights
            # packed slab [6,H]: mlp.b1, mlp.bn_g, mlp.bn_b, mlp.b2, outer.g, outer.b
            "vecs": jnp.stack([b1, ones, zeros, b2, ones, zeros]).astype(F32),
            "eps": jnp.zeros((1,), F32),
        })
    for _ in range(num_layers - 1):
        key, k1, k2 = jax.random.split(key, 3)
        w1, b1 = _dense_init(k1, H, H)
        w2, b2 = _dense_init(k2, H, H)
        vn_mlps.append({
            "w1": w1.astype(BF16), "w2": w2.astype(BF16),
            # packed slab [6,H]: b1, bn1_g, bn1_b, b2, bn2_g, bn2_b
            "vecs": jnp.stack([b1, ones, zeros, b2, ones, zeros]).astype(F32),
        })
    params["convs"] = convs
    params["vn_mlps"] = vn_mlps

    key, k = jax.random.split(key)
    pw, pb = _dense_init(k, H, num_tasks)
    params["pred_w"] = pw.astype(BF16)
    params["pred_b"] = pb.reshape(1, -1)
    return params


# ----------------------------- model forward ---------------------------------

def _sum_embeddings(tables, idx):
    # categorical embedding gather kept in plain JAX (glue, not the hot path)
    out = jnp.take(tables[0], idx[:, 0], axis=0)
    for f in range(1, len(tables)):
        out = out + jnp.take(tables[f], idx[:, f], axis=0)
    return out


def ogb_gnn_random_forward(params, graph, key, *, num_layers, hidden_dim,
                           random_vec_dim, random_vec_std=1.0):
    node_feat = graph["node_feat"]       # [N, F_atom] int32
    edge_feat = graph["edge_feat"]       # [E, F_bond] int32
    src, dst = graph["src"], graph["dst"]
    batch_node = graph["batch_node"]     # [N] int32 graph id per node
    N = node_feat.shape[0]
    E = edge_feat.shape[0]
    B = int(graph["num_graphs"])
    assert int(jnp.max(batch_node)) < B, "node with batch_id >= num_graphs"
    rvd = random_vec_dim

    n_pad = _round_up(N, 8)
    e_pad = _round_up(E, 8)

    # random feature vectors (Normal(0, random_vec_std))
    kx, ke = jax.random.split(key)
    rand_x = random_vec_std * jax.random.normal(kx, (N, rvd), F32)
    rand_edge = random_vec_std * jax.random.normal(ke, (E, rvd), F32)

    # atom encoder + concat random node features; pad node rows with zeros
    feat = _sum_embeddings(params["atom_tables"], node_feat)          # [N, H-rvd]
    x = jnp.concatenate([feat, rand_x], axis=-1)                      # [N, H]
    x = jnp.pad(x, ((0, n_pad - N), (0, 0)))

    # int32 index operands (padding sentinel -1 -> zero one-hot row/column)
    def pad_idx(v, n):
        return jnp.pad(v.astype(jnp.int32), (0, n - v.shape[0]), constant_values=-1)

    bid = pad_idx(batch_node, n_pad)
    bid_col = bid.reshape(n_pad, 1)
    bid_row = bid.reshape(1, n_pad)
    src_col = pad_idx(src, e_pad).reshape(e_pad, 1)
    dst_row = pad_idx(dst, e_pad).reshape(1, e_pad)
    nmask = (bid_col >= 0).astype(F32)                                # [N_pad,1]

    # virtual-node embedding (index 0, zero-initialized)
    vne = jnp.tile(params["vn_emb"], (B, 1))                          # [B, H]

    h = x
    out = None
    for layer in range(num_layers):
        cp = params["convs"][layer]
        ee = _sum_embeddings(cp["bond_tables"], edge_feat)            # [E, H-rvd]
        ee = jnp.concatenate([ee, rand_edge], axis=-1)                # [E, H]
        ee = jnp.pad(ee, ((0, e_pad - E), (0, 0)))
        last = layer == num_layers - 1
        if last:
            # JK='last': readout (sum pooling + graph_pred_linear) fused in-kernel
            out = gin_vn_layer(h, vne, ee, src_col, dst_row, bid_col, bid_row,
                               nmask, cp, None,
                               {"w": params["pred_w"], "b": params["pred_b"]},
                               n_real=N, num_graphs=B, last_layer=True)
        else:
            h, vne = gin_vn_layer(h, vne, ee, src_col, dst_row, bid_col, bid_row,
                                  nmask, cp, params["vn_mlps"][layer], None,
                                  n_real=N, num_graphs=B, last_layer=False)
    return out


# ----------------------------- main ------------------------------------------

if __name__ == "__main__":
    NUM_LAYERS = 2
    HIDDEN_DIM = 128          # multiple of 128 -> lane-dense slabs in every kernel
    RANDOM_VEC_DIM = 16
    NUM_TASKS = 1
    ATOM_VOCABS = (16, 8, 8)
    BOND_VOCABS = (8, 4, 4)

    key = jax.random.PRNGKey(0)
    k_params, k_nodes, k_edges, k_rand = jax.random.split(key, 4)

    # two small graphs of 6 nodes each, bidirectional path edges
    N_PER_G, B = 6, 2
    N = N_PER_G * B
    src_list, dst_list, batch_list = [], [], []
    for g in range(B):
        off = g * N_PER_G
        for i in range(N_PER_G - 1):
            src_list += [off + i, off + i + 1]
            dst_list += [off + i + 1, off + i]
        batch_list += [g] * N_PER_G
    E = len(src_list)

    graph = {
        "src": jnp.array(src_list, jnp.int32),
        "dst": jnp.array(dst_list, jnp.int32),
        "batch_node": jnp.array(batch_list, jnp.int32),
        "node_feat": jax.random.randint(k_nodes, (N, len(ATOM_VOCABS)), 0,
                                        min(ATOM_VOCABS), dtype=jnp.int32),
        "edge_feat": jax.random.randint(k_edges, (E, len(BOND_VOCABS)), 0,
                                        min(BOND_VOCABS), dtype=jnp.int32),
        "num_graphs": B,
    }

    params = init_params(k_params, NUM_LAYERS, HIDDEN_DIM, RANDOM_VEC_DIM,
                         NUM_TASKS, ATOM_VOCABS, BOND_VOCABS)

    fwd = functools.partial(ogb_gnn_random_forward,
                            num_layers=NUM_LAYERS,
                            hidden_dim=HIDDEN_DIM,
                            random_vec_dim=RANDOM_VEC_DIM,
                            random_vec_std=1.0)

    out = fwd(params, graph, k_rand)
    out = jax.block_until_ready(out)
    assert out.shape == (B, NUM_TASKS) and out.dtype == jnp.float32
    assert bool(jnp.all(jnp.isfinite(out)))
    print("KERNEL_OK")
</pallas_src>

<mosaic_0001>
module attributes {stable_mosaic.version = 11 : i64} {
  func.func @kernel(%arg0: memref<1xf32, #tpu.memory_space<smem>>, %arg1: memref<16x1xi32, #tpu.memory_space<vmem>>, %arg2: memref<1x16xi32, #tpu.memory_space<vmem>>, %arg3: memref<16x1xf32, #tpu.memory_space<vmem>>, %arg4: memref<16x128xf32, #tpu.memory_space<vmem>>, %arg5: memref<2x128xf32, #tpu.memory_space<vmem>>, %arg6: memref<24x128xf32, #tpu.memory_space<vmem>>, %arg7: memref<24x1xi32, #tpu.memory_space<vmem>>, %arg8: memref<1x24xi32, #tpu.memory_space<vmem>>, %arg9: memref<128x128xbf16, #tpu.memory_space<vmem>>, %arg10: memref<128x128xbf16, #tpu.memory_space<vmem>>, %arg11: memref<6x128xf32, #tpu.memory_space<vmem>>, %arg12: memref<128x128xbf16, #tpu.memory_space<vmem>>, %arg13: memref<128x128xbf16, #tpu.memory_space<vmem>>, %arg14: memref<6x128xf32, #tpu.memory_space<vmem>>, %arg15: memref<16x128xf32, #tpu.memory_space<vmem>>, %arg16: memref<2x128xf32, #tpu.memory_space<vmem>>) attributes {dimension_semantics = [], scalar_prefetch = 0 : i64, scratch_operands = 0 : i64, tpu.core_type = #tpu.core_type<tc>} {
    %c0 = arith.constant 0 : index
    %c0_0 = arith.constant 0 : index
    %0 = vector.load %arg3[%c0, %c0_0] : memref<16x1xf32, #tpu.memory_space<vmem>>, vector<16x1xf32>
    %c0_1 = arith.constant 0 : index
    %c0_2 = arith.constant 0 : index
    %1 = vector.load %arg5[%c0_1, %c0_2] : memref<2x128xf32, #tpu.memory_space<vmem>>, vector<2x128xf32>
    %c0_3 = arith.constant 0 : index
    %c0_4 = arith.constant 0 : index
    %2 = vector.load %arg11[%c0_3, %c0_4] : memref<6x128xf32, #tpu.memory_space<vmem>>, vector<6x128xf32>
    %3 = tpu.iota {dimensions = array<i32: 1>} : vector<1x2xi32>
    %4 = tpu.iota {dimensions = array<i32: 0>} : vector<2x1xi32>
    %5 = tpu.iota {dimensions = array<i32: 1>} : vector<1x16xi32>
    %6 = tpu.iota {dimensions = array<i32: 0>} : vector<16x1xi32>
    %c0_5 = arith.constant 0 : index
    %c0_6 = arith.constant 0 : index
    %7 = vector.load %arg1[%c0_5, %c0_6] : memref<16x1xi32, #tpu.memory_space<vmem>>, vector<16x1xi32>
    %8 = vector.broadcast %7 : vector<16x1xi32> to vector<16x2xi32>
    %9 = vector.broadcast %3 : vector<1x2xi32> to vector<16x2xi32>
    %10 = arith.cmpi eq, %8, %9 : vector<16x2xi32>
    %cst = arith.constant 1.000000e+00 : f32
    %cst_7 = arith.constant 0.000000e+00 : f32
    %11 = vector.broadcast %cst : f32 to vector<16x2xf32>
    %12 = vector.broadcast %cst_7 : f32 to vector<16x2xf32>
    %13 = arith.select %10, %11, %12 : vector<16x2xi1>, vector<16x2xf32>
    %c0_8 = arith.constant 0 : index
    %c0_9 = arith.constant 0 : index
    %14 = vector.load %arg2[%c0_8, %c0_9] : memref<1x16xi32, #tpu.memory_space<vmem>>, vector<1x16xi32>
    %15 = vector.broadcast %4 : vector<2x1xi32> to vector<2x16xi32>
    %16 = vector.broadcast %14 : vector<1x16xi32> to vector<2x16xi32>
    %17 = arith.cmpi eq, %15, %16 : vector<2x16xi32>
    %cst_10 = arith.constant 1.000000e+00 : f32
    %cst_11 = arith.constant 0.000000e+00 : f32
    %18 = vector.broadcast %cst_10 : f32 to vector<2x16xf32>
    %19 = vector.broadcast %cst_11 : f32 to vector<2x16xf32>
    %20 = arith.select %17, %18, %19 : vector<2x16xi1>, vector<2x16xf32>
    %c0_12 = arith.constant 0 : index
    %c0_13 = arith.constant 0 : index
    %21 = vector.load %arg7[%c0_12, %c0_13] : memref<24x1xi32, #tpu.memory_space<vmem>>, vector<24x1xi32>
    %22 = vector.broadcast %21 : vector<24x1xi32> to vector<24x16xi32>
    %23 = vector.broadcast %5 : vector<1x16xi32> to vector<24x16xi32>
    %24 = arith.cmpi eq, %22, %23 : vector<24x16xi32>
    %cst_14 = arith.constant 1.000000e+00 : f32
    %cst_15 = arith.constant 0.000000e+00 : f32
    %25 = vector.broadcast %cst_14 : f32 to vector<24x16xf32>
    %26 = vector.broadcast %cst_15 : f32 to vector<24x16xf32>
    %27 = arith.select %24, %25, %26 : vector<24x16xi1>, vector<24x16xf32>
    %c0_16 = arith.constant 0 : index
    %c0_17 = arith.constant 0 : index
    %28 = vector.load %arg8[%c0_16, %c0_17] : memref<1x24xi32, #tpu.memory_space<vmem>>, vector<1x24xi32>
    %29 = vector.broadcast %6 : vector<16x1xi32> to vector<16x24xi32>
    %30 = vector.broadcast %28 : vector<1x24xi32> to vector<16x24xi32>
    %31 = arith.cmpi eq, %29, %30 : vector<16x24xi32>
    %cst_18 = arith.constant 1.000000e+00 : f32
    %cst_19 = arith.constant 0.000000e+00 : f32
    %32 = vector.broadcast %cst_18 : f32 to vector<16x24xf32>
    %33 = vector.broadcast %cst_19 : f32 to vector<16x24xf32>
    %34 = arith.select %31, %32, %33 : vector<16x24xi1>, vector<16x24xf32>
    %c0_20 = arith.constant 0 : index
    %c0_21 = arith.constant 0 : index
    %35 = vector.load %arg4[%c0_20, %c0_21] : memref<16x128xf32, #tpu.memory_space<vmem>>, vector<16x128xf32>
    %cst_22 = arith.constant dense<0.000000e+00> : vector<16x128xf32>
    %36 = tpu.matmul %13, %1, %cst_22 {dimension_numbers = #tpu.dot_dimension_numbers<[1], [0], [0], [1], [0, 0, 1, 1], [], []>} : vector<16x2xf32>, vector<2x128xf32>, vector<16x128xf32> -> vector<16x128xf32>
    %37 = arith.addf %35, %36 : vector<16x128xf32>
    %cst_23 = arith.constant dense<0.000000e+00> : vector<24x128xf32>
    %38 = tpu.matmul %27, %37, %cst_23 {dimension_numbers = #tpu.dot_dimension_numbers<[1], [0], [0], [1], [0, 0, 1, 1], [], []>} : vector<24x16xf32>, vector<16x128xf32>, vector<24x128xf32> -> vector<24x128xf32>
    %c0_24 = arith.constant 0 : index
    %c0_25 = arith.constant 0 : index
    %39 = vector.load %arg6[%c0_24, %c0_25] : memref<24x128xf32, #tpu.memory_space<vmem>>, vector<24x128xf32>
    %40 = arith.addf %38, %39 : vector<24x128xf32>
    %cst_26 = arith.constant 0.000000e+00 : f32
    %41 = vector.broadcast %cst_26 : f32 to vector<24x128xf32>
    %42 = arith.maximumf %40, %41 : vector<24x128xf32>
    %cst_27 = arith.constant dense<0.000000e+00> : vector<16x128xf32>
    %43 = tpu.matmul %34, %42, %cst_27 {dimension_numbers = #tpu.dot_dimension_numbers<[1], [0], [0], [1], [0, 0, 1, 1], [], []>} : vector<16x24xf32>, vector<24x128xf32>, vector<16x128xf32> -> vector<16x128xf32>
    %c0_28 = arith.constant 0 : index
    %44 = memref.load %arg0[%c0_28] : memref<1xf32, #tpu.memory_space<smem>>
    %cst_29 = arith.constant 1.000000e+00 : f32
    %45 = arith.addf %cst_29, %44 : f32
    %46 = vector.broadcast %45 : f32 to vector<16x128xf32>
    %47 = arith.mulf %46, %37 : vector<16x128xf32>
    %48 = arith.addf %47, %43 : vector<16x128xf32>
    %49 = arith.truncf %48 : vector<16x128xf32> to vector<16x128xbf16>
    %c0_30 = arith.constant 0 : index
    %c0_31 = arith.constant 0 : index
    %50 = vector.load %arg9[%c0_30, %c0_31] : memref<128x128xbf16, #tpu.memory_space<vmem>>, vector<128x128xbf16>
    %cst_32 = arith.constant dense<0.000000e+00> : vector<16x128xf32>
    %51 = tpu.matmul %49, %50, %cst_32 {dimension_numbers = #tpu.dot_dimension_numbers<[1], [0], [0], [1], [0, 0, 1, 1], [], []>} : vector<16x128xbf16>, vector<128x128xbf16>, vector<16x128xf32> -> vector<16x128xf32>
    %52 = vector.extract_strided_slice %2 {offsets = [0, 0], sizes = [1, 128], strides = [1, 1]} : vector<6x128xf32> to vector<1x128xf32>
    %53 = vector.broadcast %52 : vector<1x128xf32> to vector<16x128xf32>
    %54 = arith.addf %51, %53 : vector<16x128xf32>
    %55 = vector.extract_strided_slice %2 {offsets = [1, 0], sizes = [1, 128], strides = [1, 1]} : vector<6x128xf32> to vector<1x128xf32>
    %56 = vector.extract_strided_slice %2 {offsets = [2, 0], sizes = [1, 128], strides = [1, 1]} : vector<6x128xf32> to vector<1x128xf32>
    %57 = vector.broadcast %0 : vector<16x1xf32> to vector<16x128xf32>
    %58 = arith.mulf %54, %57 : vector<16x128xf32>
    %cst_33 = arith.constant dense<0.000000e+00> : vector<128xf32>
    %59 = vector.multi_reduction <add>, %58, %cst_33 [0] : vector<16x128xf32> to vector<128xf32>
    %60 = vector.shape_cast %59 : vector<128xf32> to vector<1x128xf32>
    %61 = arith.mulf %58, %58 : vector<16x128xf32>
    %cst_34 = arith.constant dense<0.000000e+00> : vector<128xf32>
    %62 = vector.multi_reduction <add>, %61, %cst_34 [0] : vector<16x128xf32> to vector<128xf32>
    %63 = vector.shape_cast %62 : vector<128xf32> to vector<1x128xf32>
    %cst_35 = arith.constant 0.0833333358 : f32
    %64 = vector.broadcast %cst_35 : f32 to vector<1x128xf32>
    %65 = arith.mulf %60, %64 : vector<1x128xf32>
    %cst_36 = arith.constant 0.0833333358 : f32
    %66 = vector.broadcast %cst_36 : f32 to vector<1x128xf32>
    %67 = arith.mulf %63, %66 : vector<1x128xf32>
    %68 = arith.mulf %65, %65 : vector<1x128xf32>
    %69 = arith.subf %67, %68 : vector<1x128xf32>
    %70 = vector.broadcast %65 : vector<1x128xf32> to vector<16x128xf32>
    %71 = arith.subf %54, %70 : vector<16x128xf32>
    %cst_37 = arith.constant 9.99999974E-6 : f32
    %72 = vector.broadcast %cst_37 : f32 to vector<1x128xf32>
    %73 = arith.addf %69, %72 : vector<1x128xf32>
    %74 = math.rsqrt %73 : vector<1x128xf32>
    %75 = vector.broadcast %74 : vector<1x128xf32> to vector<16x128xf32>
    %76 = arith.mulf %71, %75 : vector<16x128xf32>
    %77 = vector.broadcast %55 : vector<1x128xf32> to vector<16x128xf32>
    %78 = arith.mulf %76, %77 : vector<16x128xf32>
    %79 = vector.broadcast %56 : vector<1x128xf32> to vector<16x128xf32>
    %80 = arith.addf %78, %79 : vector<16x128xf32>
    %cst_38 = arith.constant 0.000000e+00 : f32
    %81 = vector.broadcast %cst_38 : f32 to vector<16x128xf32>
    %82 = arith.maximumf %80, %81 : vector<16x128xf32>
    %83 = arith.truncf %82 : vector<16x128xf32> to vector<16x128xbf16>
    %c0_39 = arith.constant 0 : index
    %c0_40 = arith.constant 0 : index
    %84 = vector.load %arg10[%c0_39, %c0_40] : memref<128x128xbf16, #tpu.memory_space<vmem>>, vector<128x128xbf16>
    %cst_41 = arith.constant dense<0.000000e+00> : vector<16x128xf32>
    %85 = tpu.matmul %83, %84, %cst_41 {dimension_numbers = #tpu.dot_dimension_numbers<[1], [0], [0], [1], [0, 0, 1, 1], [], []>} : vector<16x128xbf16>, vector<128x128xbf16>, vector<16x128xf32> -> vector<16x128xf32>
    %86 = vector.extract_strided_slice %2 {offsets = [3, 0], sizes = [1, 128], strides = [1, 1]} : vector<6x128xf32> to vector<1x128xf32>
    %87 = vector.broadcast %86 : vector<1x128xf32> to vector<16x128xf32>
    %88 = arith.addf %85, %87 : vector<16x128xf32>
    %89 = vector.extract_strided_slice %2 {offsets = [4, 0], sizes = [1, 128], strides = [1, 1]} : vector<6x128xf32> to vector<1x128xf32>
    %90 = vector.extract_strided_slice %2 {offsets = [5, 0], sizes = [1, 128], strides = [1, 1]} : vector<6x128xf32> to vector<1x128xf32>
    %91 = vector.broadcast %0 : vector<16x1xf32> to vector<16x128xf32>
    %92 = arith.mulf %88, %91 : vector<16x128xf32>
    %cst_42 = arith.constant dense<0.000000e+00> : vector<128xf32>
    %93 = vector.multi_reduction <add>, %92, %cst_42 [0] : vector<16x128xf32> to vector<128xf32>
    %94 = vector.shape_cast %93 : vector<128xf32> to vector<1x128xf32>
    %95 = arith.mulf %92, %92 : vector<16x128xf32>
    %cst_43 = arith.constant dense<0.000000e+00> : vector<128xf32>
    %96 = vector.multi_reduction <add>, %95, %cst_43 [0] : vector<16x128xf32> to vector<128xf32>
    %97 = vector.shape_cast %96 : vector<128xf32> to vector<1x128xf32>
    %cst_44 = arith.constant 0.0833333358 : f32
    %98 = vector.broadcast %cst_44 : f32 to vector<1x128xf32>
    %99 = arith.mulf %94, %98 : vector<1x128xf32>
    %cst_45 = arith.constant 0.0833333358 : f32
    %100 = vector.broadcast %cst_45 : f32 to vector<1x128xf32>
    %101 = arith.mulf %97, %100 : vector<1x128xf32>
    %102 = arith.mulf %99, %99 : vector<1x128xf32>
    %103 = arith.subf %101, %102 : vector<1x128xf32>
    %104 = vector.broadcast %99 : vector<1x128xf32> to vector<16x128xf32>
    %105 = arith.subf %88, %104 : vector<16x128xf32>
    %cst_46 = arith.constant 9.99999974E-6 : f32
    %106 = vector.broadcast %cst_46 : f32 to vector<1x128xf32>
    %107 = arith.addf %103, %106 : vector<1x128xf32>
    %108 = math.rsqrt %107 : vector<1x128xf32>
    %109 = vector.broadcast %108 : vector<1x128xf32> to vector<16x128xf32>
    %110 = arith.mulf %105, %109 : vector<16x128xf32>
    %111 = vector.broadcast %89 : vector<1x128xf32> to vector<16x128xf32>
    %112 = arith.mulf %110, %111 : vector<16x128xf32>
    %113 = vector.broadcast %90 : vector<1x128xf32> to vector<16x128xf32>
    %114 = arith.addf %112, %113 : vector<16x128xf32>
    %cst_47 = arith.constant 0.000000e+00 : f32
    %115 = vector.broadcast %cst_47 : f32 to vector<16x128xf32>
    %116 = arith.maximumf %114, %115 : vector<16x128xf32>
    %117 = vector.broadcast %0 : vector<16x1xf32> to vector<16x128xf32>
    %118 = arith.mulf %116, %117 : vector<16x128xf32>
    %c0_48 = arith.constant 0 : index
    %c0_49 = arith.constant 0 : index
    %119 = vector.load %arg15[%c0_48, %c0_49] : memref<16x128xf32, #tpu.memory_space<vmem>>, vector<16x128xf32>
    tpu.vector_store %arg15[%c0_48, %c0_49], %118 {strides = array<i32>} : memref<16x128xf32, #tpu.memory_space<vmem>>, vector<16x128xf32>,
    %c0_50 = arith.constant 0 : index
    %c0_51 = arith.constant 0 : index
    %120 = vector.load %arg14[%c0_50, %c0_51] : memref<6x128xf32, #tpu.memory_space<vmem>>, vector<6x128xf32>
    %cst_52 = arith.constant dense<0.000000e+00> : vector<2x128xf32>
    %121 = tpu.matmul %20, %37, %cst_52 {dimension_numbers = #tpu.dot_dimension_numbers<[1], [0], [0], [1], [0, 0, 1, 1], [], []>} : vector<2x16xf32>, vector<16x128xf32>, vector<2x128xf32> -> vector<2x128xf32>
    %122 = arith.addf %121, %1 : vector<2x128xf32>
    %123 = arith.truncf %122 : vector<2x128xf32> to vector<2x128xbf16>
    %c0_53 = arith.constant 0 : index
    %c0_54 = arith.constant 0 : index
    %124 = vector.load %arg12[%c0_53, %c0_54] : memref<128x128xbf16, #tpu.memory_space<vmem>>, vector<128x128xbf16>
    %cst_55 = arith.constant dense<0.000000e+00> : vector<2x128xf32>
    %125 = tpu.matmul %123, %124, %cst_55 {dimension_numbers = #tpu.dot_dimension_numbers<[1], [0], [0], [1], [0, 0, 1, 1], [], []>} : vector<2x128xbf16>, vector<128x128xbf16>, vector<2x128xf32> -> vector<2x128xf32>
    %126 = vector.extract_strided_slice %120 {offsets = [0, 0], sizes = [1, 128], strides = [1, 1]} : vector<6x128xf32> to vector<1x128xf32>
    %127 = vector.broadcast %126 : vector<1x128xf32> to vector<2x128xf32>
    %128 = arith.addf %125, %127 : vector<2x128xf32>
    %129 = vector.extract_strided_slice %120 {offsets = [1, 0], sizes = [1, 128], strides = [1, 1]} : vector<6x128xf32> to vector<1x128xf32>
    %130 = vector.extract_strided_slice %120 {offsets = [2, 0], sizes = [1, 128], strides = [1, 1]} : vector<6x128xf32> to vector<1x128xf32>
    %cst_56 = arith.constant dense<0.000000e+00> : vector<128xf32>
    %131 = vector.multi_reduction <add>, %128, %cst_56 [0] : vector<2x128xf32> to vector<128xf32>
    %132 = vector.shape_cast %131 : vector<128xf32> to vector<1x128xf32>
    %133 = arith.mulf %128, %128 : vector<2x128xf32>
    %cst_57 = arith.constant dense<0.000000e+00> : vector<128xf32>
    %134 = vector.multi_reduction <add>, %133, %cst_57 [0] : vector<2x128xf32> to vector<128xf32>
    %135 = vector.shape_cast %134 : vector<128xf32> to vector<1x128xf32>
    %cst_58 = arith.constant 5.000000e-01 : f32
    %136 = vector.broadcast %cst_58 : f32 to vector<1x128xf32>
    %137 = arith.mulf %132, %136 : vector<1x128xf32>
    %cst_59 = arith.constant 5.000000e-01 : f32
    %138 = vector.broadcast %cst_59 : f32 to vector<1x128xf32>
    %139 = arith.mulf %135, %138 : vector<1x128xf32>
    %140 = arith.mulf %137, %137 : vector<1x128xf32>
    %141 = arith.subf %139, %140 : vector<1x128xf32>
    %142 = vector.broadcast %137 : vector<1x128xf32> to vector<2x128xf32>
    %143 = arith.subf %128, %142 : vector<2x128xf32>
    %cst_60 = arith.constant 9.99999974E-6 : f32
    %144 = vector.broadcast %cst_60 : f32 to vector<1x128xf32>
    %145 = arith.addf %141, %144 : vector<1x128xf32>
    %146 = math.rsqrt %145 : vector<1x128xf32>
    %147 = vector.broadcast %146 : vector<1x128xf32> to vector<2x128xf32>
    %148 = arith.mulf %143, %147 : vector<2x128xf32>
    %149 = vector.broadcast %129 : vector<1x128xf32> to vector<2x128xf32>
    %150 = arith.mulf %148, %149 : vector<2x128xf32>
    %151 = vector.broadcast %130 : vector<1x128xf32> to vector<2x128xf32>
    %152 = arith.addf %150, %151 : vector<2x128xf32>
    %cst_61 = arith.constant 0.000000e+00 : f32
    %153 = vector.broadcast %cst_61 : f32 to vector<2x128xf32>
    %154 = arith.maximumf %152, %153 : vector<2x128xf32>
    %155 = arith.truncf %154 : vector<2x128xf32> to vector<2x128xbf16>
    %c0_62 = arith.constant 0 : index
    %c0_63 = arith.constant 0 : index
    %156 = vector.load %arg13[%c0_62, %c0_63] : memref<128x128xbf16, #tpu.memory_space<vmem>>, vector<128x128xbf16>
    %cst_64 = arith.constant dense<0.000000e+00> : vector<2x128xf32>
    %157 = tpu.matmul %155, %156, %cst_64 {dimension_numbers = #tpu.dot_dimension_numbers<[1], [0], [0], [1], [0, 0, 1, 1], [], []>} : vector<2x128xbf16>, vector<128x128xbf16>, vector<2x128xf32> -> vector<2x128xf32>
    %158 = vector.extract_strided_slice %120 {offsets = [3, 0], sizes = [1, 128], strides = [1, 1]} : vector<6x128xf32> to vector<1x128xf32>
    %159 = vector.broadcast %158 : vector<1x128xf32> to vector<2x128xf32>
    %160 = arith.addf %157, %159 : vector<2x128xf32>
    %161 = vector.extract_strided_slice %120 {offsets = [4, 0], sizes = [1, 128], strides = [1, 1]} : vector<6x128xf32> to vector<1x128xf32>
    %162 = vector.extract_strided_slice %120 {offsets = [5, 0], sizes = [1, 128], strides = [1, 1]} : vector<6x128xf32> to vector<1x128xf32>
    %cst_65 = arith.constant dense<0.000000e+00> : vector<128xf32>
    %163 = vector.multi_reduction <add>, %160, %cst_65 [0] : vector<2x128xf32> to vector<128xf32>
    %164 = vector.shape_cast %163 : vector<128xf32> to vector<1x128xf32>
    %165 = arith.mulf %160, %160 : vector<2x128xf32>
    %cst_66 = arith.constant dense<0.000000e+00> : vector<128xf32>
    %166 = vector.multi_reduction <add>, %165, %cst_66 [0] : vector<2x128xf32> to vector<128xf32>
    %167 = vector.shape_cast %166 : vector<128xf32> to vector<1x128xf32>
    %cst_67 = arith.constant 5.000000e-01 : f32
    %168 = vector.broadcast %cst_67 : f32 to vector<1x128xf32>
    %169 = arith.mulf %164, %168 : vector<1x128xf32>
    %cst_68 = arith.constant 5.000000e-01 : f32
    %170 = vector.broadcast %cst_68 : f32 to vector<1x128xf32>
    %171 = arith.mulf %167, %170 : vector<1x128xf32>
    %172 = arith.mulf %169, %169 : vector<1x128xf32>
    %173 = arith.subf %171, %172 : vector<1x128xf32>
    %174 = vector.broadcast %169 : vector<1x128xf32> to vector<2x128xf32>
    %175 = arith.subf %160, %174 : vector<2x128xf32>
    %cst_69 = arith.constant 9.99999974E-6 : f32
    %176 = vector.broadcast %cst_69 : f32 to vector<1x128xf32>
    %177 = arith.addf %173, %176 : vector<1x128xf32>
    %178 = math.rsqrt %177 : vector<1x128xf32>
    %179 = vector.broadcast %178 : vector<1x128xf32> to vector<2x128xf32>
    %180 = arith.mulf %175, %179 : vector<2x128xf32>
    %181 = vector.broadcast %161 : vector<1x128xf32> to vector<2x128xf32>
    %182 = arith.mulf %180, %181 : vector<2x128xf32>
    %183 = vector.broadcast %162 : vector<1x128xf32> to vector<2x128xf32>
    %184 = arith.addf %182, %183 : vector<2x128xf32>
    %cst_70 = arith.constant 0.000000e+00 : f32
    %185 = vector.broadcast %cst_70 : f32 to vector<2x128xf32>
    %186 = arith.maximumf %184, %185 : vector<2x128xf32>
    %c0_71 = arith.constant 0 : index
    %c0_72 = arith.constant 0 : index
    %187 = vector.load %arg16[%c0_71, %c0_72] : memref<2x128xf32, #tpu.memory_space<vmem>>, vector<2x128xf32>
    tpu.vector_store %arg16[%c0_71, %c0_72], %186 {strides = array<i32>} : memref<2x128xf32, #tpu.memory_space<vmem>>, vector<2x128xf32>,
    return
  }
}

</mosaic_0001>

<bundles_post_ra>
// kernel: tpu_custom_call.1
= control target key start
LH: loop header
LB: loop body
LE: loop exit
PB: predicated region body
PF: predicated region fallthrough
CT: control target
= control target key end

     0   :  { %s2443_s0 = inlined_call_operand.<no memory space> [shape: f32[1], index: 0, kind: input, shape index: {}]   ;;  %s2444_s1 = inlined_call_operand.hbm [shape: s32[16,1], index: 1, kind: input, shape index: {}]   ;;  %s2445_s2 = inlined_call_operand.hbm [shape: s32[1,16], index: 2, kind: input, shape index: {}]   ;;  %s2446_s3 = inlined_call_operand.hbm [shape: f32[16,1], index: 3, kind: input, shape index: {}]   ;;  %s2447_s4 = inlined_call_operand.hbm [shape: f32[16,128], index: 4, kind: input, shape index: {}, may-alias: {4,15}]   ;;  %s2448_s5 = inlined_call_operand.hbm [shape: f32[2,128], index: 5, kind: input, shape index: {}, may-alias: {5,16}]   ;;  %s2449_s6 = inlined_call_operand.hbm [shape: f32[24,128], index: 6, kind: input, shape index: {}]   ;;  %s2450_s7 = inlined_call_operand.hbm [shape: s32[24,1], index: 7, kind: input, shape index: {}]   ;;  %s2451_s8 = inlined_call_operand.hbm [shape: s32[1,24], index: 8, kind: input, shape index: {}]   ;;  %s2452_s9 = inlined_call_operand.hbm [shape: bf16[128,128], index: 9, kind: input, shape index: {}]   ;;  %s2453_s10 = inlined_call_operand.hbm [shape: bf16[128,128], index: 10, kind: input, shape index: {}]   ;;  %s2454_s11 = inlined_call_operand.hbm [shape: f32[6,128], index: 11, kind: input, shape index: {}]   ;;  %s2455_s12 = inlined_call_operand.hbm [shape: bf16[128,128], index: 12, kind: input, shape index: {}]   ;;  %s2456_s13 = inlined_call_operand.hbm [shape: bf16[128,128], index: 13, kind: input, shape index: {}]   ;;  %s2457_s14 = inlined_call_operand.hbm [shape: f32[6,128], index: 14, kind: input, shape index: {}]   ;;  %s2458_s15 = inlined_call_operand.hbm [shape: f32[16,128], index: 15, kind: output, shape index: {0}, may-alias: {4,15}]   ;;  %s2459_s16 = inlined_call_operand.hbm [shape: f32[2,128], index: 16, kind: output, shape index: {1}, may-alias: {5,16}]  }
   0x1   :  { %2460 = sst [smem:[#allocation39_spill]] %s2443_s0 }
   0x2   :  { %23 = vsyncpa [#allocation4], 0 }
   0x3   :  { %24 = vsyncpa [#allocation7], 0 }
   0x4   :  { %25 = vsyncpa [#allocation10], 0 }
   0x5   :  { %26 = vsyncpa [#allocation13], 0 }
   0x6   :  { %27 = vsyncpa [#allocation16], 0 }
   0x7   :  { %28 = vsyncpa [#allocation19], 0 }
   0x8   :  { %29 = vsyncpa [#allocation22], 0 }
   0x9   :  { %30 = vsyncpa [#allocation25], 0 }
   0xa   :  { %31 = vsyncpa [#allocation5], 0 }
   0xb   :  { %32 = vsyncpa [#allocation28], 0  ;;  %s1940_s21 = smov [#allocation6]   ;;  %s1568_s25 = scalar_lea.hbm %s2445_s2, 16 }
   0xc   :  { %s53_s22 = sshll.u32 %s1940_s21, 4  ;;  %p1569_p0 = scmp.ne.s32.totalorder %s2445_s2, %s1568_s25  ;;  %s54_s22 = int_to_ptr.vmem [resolvable:$true] %s53_s22 }
   0xd   :  { %p1572_p1 = scmp.lt.u32.totalorder %s1568_s25, %s2445_s2 }
   0xf   :  { %p1574_p2 = pnand %p1572_p1, %p1569_p0 }
  0x11   :  { %1577 = shalt.err (!%p1574_p2)
}
  0x12   :  { %s1578_s30 = scalar_lea.vmem %s54_s22, 16  ;;  %s1582_s0 = scalar_lea.vmem %s54_s22, 32 }
  0x13   :  { %p1579_p3 = scmp.ne.s32.totalorder %s54_s22, %s1578_s30  ;;  %p1583_p4 = scmp.lt.s32.totalorder %s54_s22, %s54_s22 }
  0x14   :  { %p1584_p5 = scmp.lt.s32.totalorder %s1582_s0, %s1578_s30 }
  0x16   :  { %p1585_p6 = por %p1584_p5, %p1583_p4 }
  0x18   :  { %p1586_p7 = pnand %p1585_p6, %p1579_p3 }
  0x1a   :  { %1589 = shalt.err (!%p1586_p7)
}
  0x1b   :  { %56 = dma.hbm_to_vmem [thread:$0]  %s2445_s2, 16, %s54_s22, [#allocation7]  }
  0x1c   :  { %s1941_s19 = smov [#allocation9]   ;;  %s1942_s21 = smov [#allocation12]  }
  0x1d   :  { %s74_s20 = sshll.u32 %s1941_s19, 4  ;;  %s96_s23 = sshll.u32 %s1942_s21, 4  ;;  %s75_s20 = int_to_ptr.vmem [resolvable:$true] %s74_s20  ;;  %s97_s23 = int_to_ptr.vmem [resolvable:$true] %s96_s23 }
  0x1e   :  { %s1590_s26 = scalar_lea.hbm %s2447_s4, 256 }
  0x1f   :  { %p1591_p8 = scmp.ne.s32.totalorder %s2447_s4, %s1590_s26  ;;  %p1594_p9 = scmp.lt.u32.totalorder %s1590_s26, %s2447_s4 }
  0x21   :  { %p1596_p10 = pnand %p1594_p9, %p1591_p8 }
  0x23   :  { %1599 = shalt.err (!%p1596_p10)
}
  0x24   :  { %s1600_s2 = scalar_lea.vmem %s75_s20, 256  ;;  %p1605_p12 = scmp.lt.s32.totalorder %s75_s20, %s75_s20 }
  0x25   :  { %p1601_p11 = scmp.ne.s32.totalorder %s75_s20, %s1600_s2  ;;  %p1606_p13 = scmp.lt.s32.totalorder %s1600_s2, %s1600_s2 }
  0x27   :  { %p1607_p0 = por %p1606_p13, %p1605_p12 }
  0x29   :  { %p1608_p1 = pnand %p1607_p0, %p1601_p11 }
  0x2b   :  { %1611 = shalt.err (!%p1608_p1)
}
  0x2c   :  { %s1943_s22 = smov 128   ;;  %s1944_s0 = smov 8  }
  0x2d   :  { %80 = dma.hbm_to_vmem [thread:$0]  %s2447_s4, 256, %s75_s20, [#allocation10], %s1943_s22, %s1943_s22, %s1944_s0  }
  0x2e   :  { %s1612_s24 = scalar_lea.hbm %s2449_s6, 384 }
  0x2f   :  { %p1613_p2 = scmp.ne.s32.totalorder %s2449_s6, %s1612_s24  ;;  %p1616_p3 = scmp.lt.u32.totalorder %s1612_s24, %s2449_s6 }
  0x31   :  { %p1618_p4 = pnand %p1616_p3, %p1613_p2 }
  0x33   :  { %1621 = shalt.err (!%p1618_p4)
}
  0x34   :  { %s1622_s29 = scalar_lea.vmem %s97_s23, 384  ;;  %p1627_p6 = scmp.lt.s32.totalorder %s97_s23, %s97_s23 }
  0x35   :  { %p1623_p5 = scmp.ne.s32.totalorder %s97_s23, %s1622_s29  ;;  %p1628_p7 = scmp.lt.s32.totalorder %s1622_s29, %s1622_s29 }
  0x37   :  { %p1629_p8 = por %p1628_p7, %p1627_p6 }
  0x39   :  { %p1630_p9 = pnand %p1629_p8, %p1623_p5 }
  0x3b   :  { %1633 = shalt.err (!%p1630_p9)
}
  0x3c   :  { %102 = dma.hbm_to_vmem [thread:$0]  %s2449_s6, 384, %s97_s23, [#allocation13], %s1943_s22, %s1943_s22, %s1944_s0  }
  0x3d   :  { %s1945_s30 = smov [#allocation15]   ;;  %s1634_s19 = scalar_lea.hbm %s2451_s8, 16 }
  0x3e   :  { %s121_s2 = sshll.u32 %s1945_s30, 4  ;;  %p1635_p10 = scmp.ne.s32.totalorder %s2451_s8, %s1634_s19  ;;  %s122_s2 = int_to_ptr.vmem [resolvable:$true] %s121_s2 }
  0x3f   :  { %p1638_p11 = scmp.lt.u32.totalorder %s1634_s19, %s2451_s8 }
  0x41   :  { %p1640_p12 = pnand %p1638_p11, %p1635_p10 }
  0x43   :  { %1643 = shalt.err (!%p1640_p12)
}
  0x44   :  { %s1644_s27 = scalar_lea.vmem %s122_s2, 16  ;;  %s1648_s6 = scalar_lea.vmem %s122_s2, 32 }
  0x45   :  { %p1645_p13 = scmp.ne.s32.totalorder %s122_s2, %s1644_s27  ;;  %p1649_p0 = scmp.lt.s32.totalorder %s122_s2, %s122_s2 }
  0x46   :  { %p1650_p1 = scmp.lt.s32.totalorder %s1648_s6, %s1644_s27 }
  0x48   :  { %p1651_p2 = por %p1650_p1, %p1649_p0 }
  0x4a   :  { %p1652_p3 = pnand %p1651_p2, %p1645_p13 }
  0x4c   :  { %1655 = shalt.err (!%p1652_p3)
}
  0x4d   :  { %124 = dma.hbm_to_vmem [thread:$0]  %s2451_s8, 16, %s122_s2, [#allocation16]  }
  0x4e   :  { %s1946_s29 = smov [#allocation18]   ;;  %s1947_s20 = smov [#allocation21]  }
  0x4f   :  { %s142_s4 = sshll.u32 %s1946_s29, 4  ;;  %s164_s30 = sshll.u32 %s1947_s20, 4  ;;  %s143_s4 = int_to_ptr.vmem [resolvable:$true] %s142_s4  ;;  %s2103_s30 = int_to_ptr.vmem [resolvable:$true] %s164_s30 }
  0x50   :  { %s1656_s19 = scalar_lea.hbm %s2453_s10, 1024 }
  0x51   :  { %p1657_p4 = scmp.ne.s32.totalorder %s2453_s10, %s1656_s19  ;;  %p1660_p5 = scmp.lt.u32.totalorder %s1656_s19, %s2453_s10 }
  0x53   :  { %p1662_p6 = pnand %p1660_p5, %p1657_p4 }
  0x55   :  { %1665 = shalt.err (!%p1662_p6)
}
  0x56   :  { %s1666_s8 = scalar_lea.vmem %s143_s4, 1024  ;;  %p1671_p8 = scmp.lt.s32.totalorder %s143_s4, %s143_s4 }
  0x57   :  { %p1667_p7 = scmp.ne.s32.totalorder %s143_s4, %s1666_s8  ;;  %p1672_p9 = scmp.lt.s32.totalorder %s1666_s8, %s1666_s8 }
  0x59   :  { %p1673_p10 = por %p1672_p9, %p1671_p8 }
  0x5b   :  { %p1674_p11 = pnand %p1673_p10, %p1667_p7 }
  0x5d   :  { %1677 = shalt.err (!%p1674_p11)
}
  0x5e   :  { %s1948_s2 = smov 64   ;;  %s1949_s27 = smov 4  }
  0x5f   :  { %148 = dma.hbm_to_vmem [thread:$0]  %s2453_s10, 1024, %s143_s4, [#allocation19], %s1948_s2, %s1948_s2, %s1949_s27  }
  0x60   :  { %s1678_s20 = scalar_lea.hbm %s2455_s12, 1024 }
  0x61   :  { %p1679_p12 = scmp.ne.s32.totalorder %s2455_s12, %s1678_s20  ;;  %p1682_p13 = scmp.lt.u32.totalorder %s1678_s20, %s2455_s12 }
  0x63   :  { %p1684_p0 = pnand %p1682_p13, %p1679_p12 }
  0x65   :  { %1687 = shalt.err (!%p1684_p0)
}
  0x66   :  { %s1688_s24 = scalar_lea.vmem %s2103_s30, 1024  ;;  %p1693_p2 = scmp.lt.s32.totalorder %s2103_s30, %s2103_s30 }
  0x67   :  { %p1689_p1 = scmp.ne.s32.totalorder %s2103_s30, %s1688_s24  ;;  %p1694_p3 = scmp.lt.s32.totalorder %s1688_s24, %s1688_s24 }
  0x69   :  { %p1695_p4 = por %p1694_p3, %p1693_p2 }
  0x6b   :  { %p1696_p5 = pnand %p1695_p4, %p1689_p1 }
  0x6d   :  { %1699 = shalt.err (!%p1696_p5)
}
  0x6e   :  { %170 = dma.hbm_to_vmem [thread:$0]  %s2455_s12, 1024, %s2103_s30, [#allocation22], %s1948_s2, %s1948_s2, %s1949_s27  }
  0x6f   :  { %s1950_s25 = smov [#allocation3]   ;;  %s1951_s8 = smov [#allocation8]  }
  0x70   :  { %s40_s26 = sshll.u32 %s1950_s25, 4  ;;  %s62_s6 = sshll.u32 %s1951_s8, 4  ;;  %s41_s26 = int_to_ptr.vmem [resolvable:$true] %s40_s26  ;;  %s2140_s6 = int_to_ptr.vmem [resolvable:$true] %s62_s6 }
  0x71   :  { %s1700_s29 = scalar_lea.hbm %s2444_s1, 256 }
  0x72   :  { %p1701_p6 = scmp.ne.s32.totalorder %s2444_s1, %s1700_s29  ;;  %p1704_p7 = scmp.lt.u32.totalorder %s1700_s29, %s2444_s1 }
  0x74   :  { %p1706_p8 = pnand %p1704_p7, %p1701_p6 }
  0x76   :  { %1709 = shalt.err (!%p1706_p8)
}
  0x77   :  { %s1710_s12 = scalar_lea.vmem %s41_s26, 256  ;;  %p1715_p10 = scmp.lt.s32.totalorder %s41_s26, %s41_s26 }
  0x78   :  { %p1711_p9 = scmp.ne.s32.totalorder %s41_s26, %s1710_s12  ;;  %p1716_p11 = scmp.lt.s32.totalorder %s1710_s12, %s1710_s12 }
  0x7a   :  { %p1717_p12 = por %p1716_p11, %p1715_p10 }
  0x7c   :  { %p1718_p13 = pnand %p1717_p12, %p1711_p9 }
  0x7e   :  { %1721 = shalt.err (!%p1718_p13)
}
  0x7f   :  { %46 = dma.hbm_to_vmem [thread:$0]  %s2444_s1, 256, %s41_s26, [#allocation4], %s1943_s22, %s1943_s22, %s1944_s0  }
  0x80   :  { %s1722_s4 = scalar_lea.hbm %s2446_s3, 256 }
  0x81   :  { %p1723_p0 = scmp.ne.s32.totalorder %s2446_s3, %s1722_s4  ;;  %p1726_p1 = scmp.lt.u32.totalorder %s1722_s4, %s2446_s3 }
  0x83   :  { %p1728_p2 = pnand %p1726_p1, %p1723_p0 }
  0x85   :  { %1731 = shalt.err (!%p1728_p2)
}
  0x86   :  { %s1732_s29 = scalar_lea.vmem %s2140_s6, 256  ;;  %p1737_p4 = scmp.lt.s32.totalorder %s2140_s6, %s2140_s6 }
  0x87   :  { %p1733_p3 = scmp.ne.s32.totalorder %s2140_s6, %s1732_s29  ;;  %p1738_p5 = scmp.lt.s32.totalorder %s1732_s29, %s1732_s29 }
  0x89   :  { %p1739_p6 = por %p1738_p5, %p1737_p4 }
  0x8b   :  { %p1740_p7 = pnand %p1739_p6, %p1733_p3 }
  0x8d   :  { %1743 = shalt.err (!%p1740_p7)
}
  0x8e   :  { %68 = dma.hbm_to_vmem [thread:$0]  %s2446_s3, 256, %s2140_s6, [#allocation7], %s1943_s22, %s1943_s22, %s1944_s0  }
  0x8f   :  { %s1952_s20 = smov [#allocation11]   ;;  %s1953_s18 = smov [#allocation14]  }
  0x90   :  { %s87_s17 = sshll.u32 %s1952_s20, 4  ;;  %s108_s19 = sshll.u32 %s1953_s18, 4  ;;  %s88_s17 = int_to_ptr.vmem [resolvable:$true] %s87_s17  ;;  %s2177_s19 = int_to_ptr.vmem [resolvable:$true] %s108_s19 }
  0x91   :  { %s1744_s21 = scalar_lea.hbm %s2448_s5, 32 }
  0x92   :  { %p1745_p8 = scmp.ne.s32.totalorder %s2448_s5, %s1744_s21  ;;  %p1748_p9 = scmp.lt.u32.totalorder %s1744_s21, %s2448_s5 }
  0x94   :  { %p1750_p10 = pnand %p1748_p9, %p1745_p8 }
  0x96   :  { %1753 = shalt.err (!%p1750_p10)
}
  0x97   :  { %s1754_s3 = scalar_lea.vmem %s88_s17, 32  ;;  %p1759_p12 = scmp.lt.s32.totalorder %s88_s17, %s88_s17 }
  0x98   :  { %p1755_p11 = scmp.ne.s32.totalorder %s88_s17, %s1754_s3  ;;  %p1760_p13 = scmp.lt.s32.totalorder %s1754_s3, %s1754_s3 }
  0x9a   :  { %p1761_p0 = por %p1760_p13, %p1759_p12 }
  0x9c   :  { %p1762_p1 = pnand %p1761_p0, %p1755_p11 }
  0x9e   :  { %1765 = shalt.err (!%p1762_p1)
}
  0x9f   :  { %90 = dma.hbm_to_vmem [thread:$0]  %s2448_s5, 32, %s88_s17, [#allocation10]  }
  0xa0   :  { %s1766_s29 = scalar_lea.hbm %s2450_s7, 384 }
  0xa1   :  { %p1767_p2 = scmp.ne.s32.totalorder %s2450_s7, %s1766_s29  ;;  %p1770_p3 = scmp.lt.u32.totalorder %s1766_s29, %s2450_s7 }
  0xa3   :  { %p1772_p4 = pnand %p1770_p3, %p1767_p2 }
  0xa5   :  { %1775 = shalt.err (!%p1772_p4)
}
  0xa6   :  { %s1776_s12 = scalar_lea.vmem %s2177_s19, 384  ;;  %p1781_p6 = scmp.lt.s32.totalorder %s2177_s19, %s2177_s19 }
  0xa7   :  { %p1777_p5 = scmp.ne.s32.totalorder %s2177_s19, %s1776_s12  ;;  %p1782_p7 = scmp.lt.s32.totalorder %s1776_s12, %s1776_s12 }
  0xa9   :  { %p1783_p8 = por %p1782_p7, %p1781_p6 }
  0xab   :  { %p1784_p9 = pnand %p1783_p8, %p1777_p5 }
  0xad   :  { %1787 = shalt.err (!%p1784_p9)
}
  0xae   :  { %114 = dma.hbm_to_vmem [thread:$0]  %s2450_s7, 384, %s2177_s19, [#allocation13], %s1943_s22, %s1943_s22, %s1944_s0  }
  0xaf   :  { %s1954_s30 = smov [#allocation17]   ;;  %s1955_s24 = smov [#allocation20]  }
  0xb0   :  { %s130_s21 = sshll.u32 %s1954_s30, 4  ;;  %s155_s10 = sshll.u32 %s1955_s24, 4  ;;  %s131_s21 = int_to_ptr.vmem [resolvable:$true] %s130_s21  ;;  %s156_s10 = int_to_ptr.vmem [resolvable:$true] %s155_s10 }
  0xb1   :  { %s1788_s3 = scalar_lea.hbm %s2452_s9, 1024 }
  0xb2   :  { %p1789_p10 = scmp.ne.s32.totalorder %s2452_s9, %s1788_s3  ;;  %p1792_p11 = scmp.lt.u32.totalorder %s1788_s3, %s2452_s9 }
  0xb4   :  { %p1794_p12 = pnand %p1792_p11, %p1789_p10 }
  0xb6   :  { %1797 = shalt.err (!%p1794_p12)
}
  0xb7   :  { %s1798_s7 = scalar_lea.vmem %s131_s21, 1024  ;;  %p1803_p0 = scmp.lt.s32.totalorder %s131_s21, %s131_s21 }
  0xb8   :  { %p1799_p13 = scmp.ne.s32.totalorder %s131_s21, %s1798_s7  ;;  %p1804_p1 = scmp.lt.s32.totalorder %s1798_s7, %s1798_s7 }
  0xba   :  { %p1805_p2 = por %p1804_p1, %p1803_p0 }
  0xbc   :  { %p1806_p3 = pnand %p1805_p2, %p1799_p13 }
  0xbe   :  { %1809 = shalt.err (!%p1806_p3)
}
  0xbf   :  { %136 = dma.hbm_to_vmem [thread:$0]  %s2452_s9, 1024, %s131_s21, [#allocation16], %s1948_s2, %s1948_s2, %s1949_s27  }
  0xc0   :  { %s1810_s20 = scalar_lea.hbm %s2454_s11, 128 }
  0xc1   :  { %p1811_p4 = scmp.ne.s32.totalorder %s2454_s11, %s1810_s20  ;;  %p1814_p5 = scmp.lt.u32.totalorder %s1810_s20, %s2454_s11 }
  0xc3   :  { %p1816_p6 = pnand %p1814_p5, %p1811_p4 }
  0xc5   :  { %1819 = shalt.err (!%p1816_p6)
}
  0xc6   :  { %s1820_s30 = scalar_lea.vmem %s156_s10, 128  ;;  %p1825_p8 = scmp.lt.s32.totalorder %s156_s10, %s156_s10 }
  0xc7   :  { %p1821_p7 = scmp.ne.s32.totalorder %s156_s10, %s1820_s30  ;;  %p1826_p9 = scmp.lt.s32.totalorder %s1820_s30, %s1820_s30 }
  0xc9   :  { %p1827_p10 = por %p1826_p9, %p1825_p8 }
  0xcb   :  { %p1828_p11 = pnand %p1827_p10, %p1821_p7 }
  0xcd   :  { %1831 = shalt.err (!%p1828_p11)
}
  0xce   :  { %158 = dma.hbm_to_vmem [thread:$0]  %s2454_s11, 128, %s156_s10, [#allocation19]  }
  0xcf   :  { %s1956_s24 = smov [#allocation23]   ;;  %s1957_s25 = smov [#allocation24]  }
  0xd0   :  { %s176_s4 = sshll.u32 %s1956_s24, 4  ;;  %s189_s3 = sshll.u32 %s1957_s25, 4  ;;  %s177_s4 = int_to_ptr.vmem [resolvable:$true] %s176_s4  ;;  %s190_s3 = int_to_ptr.vmem [resolvable:$true] %s189_s3 }
  0xd1   :  { %s1832_s23 = scalar_lea.hbm %s2456_s13, 1024 }
  0xd2   :  { %p1833_p12 = scmp.ne.s32.totalorder %s2456_s13, %s1832_s23  ;;  %p1836_p13 = scmp.lt.u32.totalorder %s1832_s23, %s2456_s13 }
  0xd4   :  { %p1838_p0 = pnand %p1836_p13, %p1833_p12 }
  0xd6   :  { %1841 = shalt.err (!%p1838_p0)
}
  0xd7   :  { %s1842_s11 = scalar_lea.vmem %s177_s4, 1024  ;;  %p1847_p2 = scmp.lt.s32.totalorder %s177_s4, %s177_s4 }
  0xd8   :  { %p1843_p1 = scmp.ne.s32.totalorder %s177_s4, %s1842_s11  ;;  %p1848_p3 = scmp.lt.s32.totalorder %s1842_s11, %s1842_s11 }
  0xda   :  { %p1849_p4 = por %p1848_p3, %p1847_p2 }
  0xdc   :  { %p1850_p5 = pnand %p1849_p4, %p1843_p1 }
  0xde   :  { %1853 = shalt.err (!%p1850_p5)
}
  0xdf   :  { %182 = dma.hbm_to_vmem [thread:$0]  %s2456_s13, 1024, %s177_s4, [#allocation22], %s1948_s2, %s1948_s2, %s1949_s27  }
  0xe0   :  { %s1854_s18 = scalar_lea.hbm %s2457_s14, 128 }
  0xe1   :  { %p1855_p6 = scmp.ne.s32.totalorder %s2457_s14, %s1854_s18  ;;  %p1858_p7 = scmp.lt.u32.totalorder %s1854_s18, %s2457_s14 }
  0xe3   :  { %p1860_p8 = pnand %p1858_p7, %p1855_p6 }
  0xe5   :  { %1863 = shalt.err (!%p1860_p8)
}
  0xe6   :  { %s1864_s9 = scalar_lea.vmem %s190_s3, 128  ;;  %p1869_p10 = scmp.lt.s32.totalorder %s190_s3, %s190_s3 }
  0xe7   :  { %p1865_p9 = scmp.ne.s32.totalorder %s190_s3, %s1864_s9  ;;  %p1870_p11 = scmp.lt.s32.totalorder %s1864_s9, %s1864_s9 }
  0xe9   :  { %p1871_p12 = por %p1870_p11, %p1869_p10 }
  0xeb   :  { %p1872_p13 = pnand %p1871_p12, %p1865_p9 }
  0xed   :  { %1875 = shalt.err (!%p1872_p13)
}
  0xee   :  { %192 = dma.hbm_to_vmem [thread:$0]  %s2457_s14, 128, %s190_s3, [#allocation25]  }
  0xef   :  { %1920 = dma.done.wait [#allocation4], 256  }
  0xf0   :  { %1921 = vsyncadd [#allocation4], 4294967040 }
  0xf1   :  { %1922 = dma.done.wait [#allocation7], 272  }
  0xf2   :  { %1923 = vsyncadd [#allocation7], 4294967024 }
  0xf3   :  { %1924 = dma.done.wait [#allocation10], 288  }
  0xf4   :  { %1925 = vsyncadd [#allocation10], 4294967008 }
  0xf5   :  { %1926 = dma.done.wait [#allocation13], 768  }
  0xf6   :  { %1927 = vsyncadd [#allocation13], 4294966528 }
  0xf7   :  { %1928 = dma.done.wait [#allocation16], 1040  }
  0xf8   :  { %1929 = vsyncadd [#allocation16], 4294966256 }
  0xf9   :  { %1930 = dma.done.wait [#allocation19], 1152  }
  0xfa   :  { %1931 = vsyncadd [#allocation19], 4294966144 }
  0xfb   :  { %1932 = dma.done.wait [#allocation22], 2048  }
  0xfc   :  { %1933 = vsyncadd [#allocation22], 4294965248 }
  0xfd   :  { %1934 = dma.done.wait [#allocation25], 128  }
  0xfe   :  { %1935 = vsyncadd [#allocation25], 4294967168  ;;  %v1958_v0 = vmov 0   ;;  %v245_v1 = vld [vmem:[#allocation3] sm:$0xff]  ;;  %v246_v2 = vld [vmem:[#allocation3 + $0x8] sm:$0xff]  ;;  %vm300_vm0 = vcmask 1041408   ;;  %v240_v9 = vlaneseq }
  0xff   :  { %1526 = vset.pattern.permute.xlu0 %v1958_v0  ;;  %1527 = vset.pattern.permute.xlu1 %v1958_v0  ;;  %v266_v3 = vld [vmem:[#allocation14 + $0x10] sm:$0xff]  ;;  %v2265_v4 = vld [vmem:[#allocation11] sm:$0x3]  ;;  %v265_v7 = vld [vmem:[#allocation14 + $0x8] sm:$0xff]  ;;  %vm293_vm1 = vcmask 15360   ;;  %v1959_v12 = vmov 0.0  }
 0x100   :  { %248 = vperm.xlu0 %1526, %v245_v1   ;;  %1378 = vmatprep.subr.msk.mxu0 %vm300_vm0, %v2265_v4  ;;  %v237_v5 = vld [vmem:[#allocation8 + $0x8] sm:$0xff]  ;;  %v264_v6 = vld [vmem:[#allocation14] sm:$0xff]  ;;  %v241_v10 = vand.u32 127, %v240_v9  ;;  %v1960_v16 = vmov 0.0|0.0   ;;  %vm1961_vm4 = vmmov 0   ;;  %v291_v18 = vld [vmem:[#allocation9] sm:$0xff] }
 0x101   :  { %1379 = vmatpush3.msk.msra.mxu0 %vm300_vm0, %v2265_v4  ;;  %268 = vperm.xlu1 %1527, %v264_v6   ;;  %v236_v8 = vld [vmem:[#allocation8] sm:$0xff]  ;;  %v292_v17 = vld [vmem:[#allocation9 + $0x8] sm:$0xff]  ;;  %vm384_vm6 = vcmask 130048   ;;  %v2298_v30 = vshrl.u32 %v240_v9, 7  ;;  %v1284_v31 = vld [vmem:[#allocation15] ss:$0 sm:$0xff] }
 0x102   :  { %1492 = vmatprep.subr.bf16.mxu1 %v1960_v16  ;;  %1387 = vmatprep.mubr.msk.f32.mxu1 %vm1961_vm4, %v1959_v12  ;;  %vm477_vm10 = vcmask 195584   ;;  %v1528_v33 = vld [vmem:[#allocation17] sm:$0xff]   ;;  %v1529_v34 = vld [vmem:[#allocation17 + $0x8] sm:$0xff]   ;;  %v1530_v35 = vld [vmem:[#allocation17 + $0x10] sm:$0xff]   ;;  %s2461_s21 = sld [smem:[#allocation39_spill]]  ;;  %s1962_s4 = smov [#allocation26]  }
 0x103   :  { %vm287_vm9 = vcmp.eq.s32.totalorder %v2298_v30, %v1284_v31  ;;  %v1531_v36 = vld [vmem:[#allocation17 + $0x18] sm:$0xff]   ;;  %v1532_v37 = vld [vmem:[#allocation17 + $0x20] sm:$0xff]   ;;  %v1533_v38 = vld [vmem:[#allocation17 + $0x28] sm:$0xff]   ;;  %v244_v51 = vadd.s32 8, %v2298_v30  ;;  %s1250_s25 = sshll.u32 %s1962_s4, 4  ;;  %s1251_s25 = int_to_ptr.vmem [resolvable:$true] %s1250_s25 }
 0x104   :  { %251 = vperm.xlu0 %1526, %v246_v2   ;;  %v289_v32 = vsel %vm287_vm9, 1.0, %v1959_v12  ;;  %v1534_v39 = vld [vmem:[#allocation17 + $0x30] sm:$0xff]   ;;  %v383_v48 = vld [vmem:[#allocation12 + $0x10] sm:$0xff]  ;;  %s1876_s3 = scalar_lea.vmem %s1251_s25, 256  ;;  %p1881_p1 = scmp.lt.s32.totalorder %s1251_s25, %s1251_s25 }
 0x105   :  { %271 = vperm.xlu1 %1527, %v265_v7   ;;  %v381_v40 = vld [vmem:[#allocation12] sm:$0xff]  ;;  %v382_v43 = vld [vmem:[#allocation12 + $0x8] sm:$0xff]  ;;  %vm288_vm11 = vcmp.eq.s32.totalorder %v244_v51, %v1284_v31  ;;  %v1536_v6 = vld [vmem:[#allocation18] sm:$0xff]   ;;  %p1877_p0 = scmp.ne.s32.totalorder %s1251_s25, %s1876_s3  ;;  %p1882_p2 = scmp.lt.s32.totalorder %s1876_s3, %s1876_s3 }
 0x106   :  { %v290_v57 = vsel %vm288_vm11, 1.0, %v1959_v12  ;;  %v1535_v58 = vld [vmem:[#allocation17 + $0x38] sm:$0xff]   ;;  %v1537_v7 = vld [vmem:[#allocation18 + $0x8] sm:$0xff]  }
 0x107   :  { %v1539_v9 = vld [vmem:[#allocation18 + $0x18] sm:$0xff]   ;;  %p1883_p3 = por %p1882_p2, %p1881_p1 }
 0x108   :  { %274 = vperm.xlu0 %1526, %v266_v3   ;;  %s560_s24 = sadd.f32 1.0, %s2461_s21  ;;  %v1283_v3 = vld [vmem:[#allocation6] ss:$0 sm:$0xff] }
 0x109   :  { %678 = vperm.xlu1 %1527, %v236_v8   ;;  %vm262_vm12 = vcmp.eq.s32.totalorder %v2298_v30, %v1283_v3  ;;  %v1538_v8 = vld [vmem:[#allocation18 + $0x10] sm:$0xff]   ;;  %v1544_v3 = vld [vmem:[#allocation21] sm:$0xff]   ;;  %p1884_p4 = pnand %p1883_p3, %p1877_p0 }
 0x10a   :  { %v561_v59 = vstv %s560_s24 }
 0x10c   :  { %683 = vperm.xlu0 %1526, %v237_v5   ;;  %v263_v5 = vsel %vm262_vm12, 1.0, %v1959_v12 }
 0x17f   :  { %v249_v11 = vpop.permute.xlu0 %248 }
 0x180   :  { %vm253_vm2 = vcmp.eq.s32.totalorder %v249_v11, %v241_v10  ;;  %v269_v22 = vpop.permute.xlu1 %268  ;;  %v1541_v11 = vld [vmem:[#allocation18 + $0x28] sm:$0xff]  }
 0x181   :  { %v255_v13 = vsel %vm253_vm2, 1.0, %v1959_v12  ;;  %vm276_vm5 = vcmp.eq.s32.totalorder %v269_v22, %v241_v10 }
 0x182   :  { %1380 = vmatprep.mubr.msk.f32.mxu0 %vm293_vm1, %v255_v13  ;;  %v279_v25 = vsel %vm276_vm5, 1.0, %v1959_v12  ;;  %v1542_v13 = vld [vmem:[#allocation18 + $0x30] sm:$0xff]  }
 0x183   :  { %v252_v14 = vpop.permute.xlu0 %251 }
 0x184   :  { %vm254_vm3 = vcmp.eq.s32.totalorder %v252_v14, %v241_v10  ;;  %v272_v26 = vpop.permute.xlu1 %271  ;;  %v1543_v14 = vld [vmem:[#allocation18 + $0x38] sm:$0xff]  }
 0x185   :  { %v256_v15 = vsel %vm254_vm3, 1.0, %v1959_v12  ;;  %vm277_vm7 = vcmp.eq.s32.totalorder %v272_v26, %v241_v10 }
 0x186   :  { %1381 = vmatmul.mubr.msk.f32.vlgmr.msra.gmra.mrb[0].mxu0 %vm293_vm1, %v256_v15  ;;  %v280_v28 = vsel %vm277_vm7, 1.0, %v1959_v12  ;;  %v585_v15 = vsub.s32 0, %v2298_v30 }
 0x187   :  { %v275_v27 = vpop.permute.xlu0 %274  ;;  %1402 = vmatprep.mubr.msk.f32.mxu0 %vm477_vm10, %v289_v32 }
 0x188   :  { %vm278_vm8 = vcmp.eq.s32.totalorder %v275_v27, %v241_v10  ;;  %v1540_v10 = vld [vmem:[#allocation18 + $0x20] sm:$0xff]  }
 0x189   :  { %v281_v29 = vsel %vm278_vm8, 1.0, %v1959_v12 }
 0x18b   :  { %v2348_v26 = vpop.permute.xlu0 %683 }
 0x259   :  { %v1382_v19 = vpop.f32.mrb[0].mxu0 }
 0x25a   :  { %v2276_v20 = vadd.f32 %v1382_v19, %v292_v17  ;;  %v370_v21 = vpop.f32.mrb[1].mxu0 }
 0x25b   :  { %v2278_v23 = vadd.f32 %v370_v21, %v291_v18  ;;  %v2345_v21 = vpop.permute.xlu1 %678 }
 0x25c   :  { %v563_v60 = vmul.f32 %v561_v59, %v2276_v20 }
 0x25d   :  { %v2282_v24 = vpack.c.bf16 %v2276_v20, %v2278_v23  ;;  %v562_v62 = vmul.f32 %v561_v59, %v2278_v23 }
 0x25f   :  { %1494 = vmatpush3.bf16.msra.mxu1 %v2282_v24 }
 0x260   :  { %1405 = vmatprep.subr.bf16.mxu1 %v1959_v12 }
 0x262   :  { %1388 = vmatmul.mubr.msk.f32.vlgmr.msra.gmra.mrb[0].mxu1 %vm384_vm6, %v279_v25 }
 0x263   :  { %1390 = vmatprep.mubr.msk.f32.mxu1 %vm1961_vm4, %v1959_v12  ;;  %1406 = vmatpush3.bf16.msra.mxu1 %v1528_v33 }
 0x264   :  { %1407 = vmatprep.subr.bf16.mxu1 %v1959_v12 }
 0x266   :  { %1391 = vmatmul.mubr.msk.f32.gmra.mrb[2].mxu1 %vm384_vm6, %v280_v28 }
 0x267   :  { %1393 = vmatprep.mubr.msk.f32.mxu1 %vm1961_vm4, %v1959_v12  ;;  %1408 = vmatpush3.bf16.msra.mxu1 %v1529_v34 }
 0x268   :  { %1409 = vmatprep.subr.bf16.mxu1 %v1959_v12 }
 0x26a   :  { %1394 = vmatmul.mubr.msk.f32.gmra.mrb[4].mxu1 %vm384_vm6, %v281_v29 }
 0x26b   :  { %1421 = vmatprep.mubr.msk.bf16.mxu1 %vm1961_vm4, %v1959_v12  ;;  %1410 = vmatpush3.bf16.msra.mxu1 %v1530_v35 }
 0x26c   :  { %1411 = vmatprep.subr.bf16.mxu1 %v1959_v12 }
 0x26f   :  { %1412 = vmatpush3.bf16.msra.mxu1 %v1531_v36 }
 0x270   :  { %1413 = vmatprep.subr.bf16.mxu1 %v1959_v12 }
 0x273   :  { %1414 = vmatpush3.bf16.msra.mxu1 %v1532_v37 }
 0x274   :  { %1415 = vmatprep.subr.bf16.mxu1 %v1959_v12 }
 0x277   :  { %1416 = vmatpush3.bf16.msra.mxu1 %v1533_v38 }
 0x278   :  { %1417 = vmatprep.subr.bf16.mxu1 %v1959_v12 }
 0x27b   :  { %1418 = vmatpush3.bf16.msra.mxu1 %v1534_v39 }
 0x27c   :  { %1419 = vmatprep.subr.bf16.mxu1 %v1959_v12 }
 0x27f   :  { %1420 = vmatpush3.bf16.msra.mxu1 %v1535_v58 }
 0x280   :  { %1499 = vmatprep.subr.bf16.mxu1 %v1960_v16  ;;  %v2340_v16 = vld [vmem:[#allocation20] sm:$0x3f] }
 0x281   :  { %v586_v17 = vrot.slane %v2340_v16, %v585_v15 }
 0x335   :  { %v460_v41 = vpop.f32.mrb[0].mxu1 }
 0x336   :  { %v1389_v42 = vpop.f32.mrb[1].mxu1  ;;  %v461_v44 = vadd.f32 %v460_v41, %v381_v40 }
 0x338   :  { %v474_v49 = vmax.f32 %v461_v44, 0.0 }
 0x339   :  { %v465_v45 = vpop.f32.mrb[2].mxu1 }
 0x33a   :  { %v466_v46 = vadd.f32 %v465_v45, %v382_v43  ;;  %v1392_v47 = vpop.f32.mrb[3].mxu1 }
 0x33c   :  { %v475_v50 = vmax.f32 %v466_v46, 0.0 }
 0x33d   :  { %v470_v52 = vpop.f32.mrb[4].mxu1 }
 0x33e   :  { %v1495_v53 = vpack.c.bf16 %v475_v50, %v474_v49  ;;  %v471_v54 = vadd.f32 %v470_v52, %v383_v48  ;;  %v1395_v55 = vpop.f32.mrb[5].mxu1 }
 0x33f   :  { %v722_v55 = vsub.s32 2, %v2298_v30 }
 0x340   :  { %v476_v56 = vmax.f32 %v471_v54, 0.0  ;;  %1496 = vmatprep.subr.bf16.mxu0 %v1495_v53  ;;  %v716_v54 = vsub.s32 1, %v2298_v30 }
 0x341   :  { %1498 = vmatpush3.bf16.msra.mxu0 %v1495_v53 }
 0x342   :  { %1400 = vmatprep.subr.mxu0 %v476_v56 }
 0x345   :  { %1401 = vmatpush3.msra.mxu0 %v476_v56  ;;  %v717_v56 = vrot.slane %v2340_v16, %v716_v54 }
 0x346   :  { %1403 = vmatmul.mubr.msk.f32.vlgmr.msra.gmra.mrb[2].mxu0 %vm477_vm10, %v290_v57  ;;  %1425 = vmatprep.subr.bf16.mxu0 %v1959_v12 }
 0x347   :  { %1441 = vmatprep.mubr.msk.bf16.mxu0 %vm1961_vm4, %v1959_v12  ;;  %1426 = vmatpush3.bf16.msra.mxu0 %v1536_v6  ;;  %v1545_v6 = vld [vmem:[#allocation21 + $0x8] sm:$0xff]  }
 0x348   :  { %1427 = vmatprep.subr.bf16.mxu0 %v1959_v12 }
 0x34b   :  { %1428 = vmatpush3.bf16.msra.mxu0 %v1537_v7  ;;  %v1546_v7 = vld [vmem:[#allocation21 + $0x10] sm:$0xff]  }
 0x34c   :  { %1429 = vmatprep.subr.bf16.mxu0 %v1959_v12 }
 0x34f   :  { %1430 = vmatpush3.bf16.msra.mxu0 %v1538_v8  ;;  %v1547_v8 = vld [vmem:[#allocation21 + $0x18] sm:$0xff]  }
 0x350   :  { %1431 = vmatprep.subr.bf16.mxu0 %v1959_v12 }
 0x353   :  { %1432 = vmatpush3.bf16.msra.mxu0 %v1539_v9  ;;  %v1548_v9 = vld [vmem:[#allocation21 + $0x20] sm:$0xff]  }
 0x354   :  { %1433 = vmatprep.subr.bf16.mxu0 %v1959_v12 }
 0x357   :  { %1434 = vmatpush3.bf16.msra.mxu0 %v1540_v10  ;;  %v1549_v10 = vld [vmem:[#allocation21 + $0x28] sm:$0xff]  }
 0x358   :  { %1435 = vmatprep.subr.bf16.mxu0 %v1959_v12 }
 0x35b   :  { %1436 = vmatpush3.bf16.msra.mxu0 %v1541_v11  ;;  %v1550_v11 = vld [vmem:[#allocation21 + $0x30] sm:$0xff]  }
 0x35c   :  { %1437 = vmatprep.subr.bf16.mxu0 %v1959_v12 }
 0x35f   :  { %1438 = vmatpush3.bf16.msra.mxu0 %v1542_v13 }
 0x360   :  { %1439 = vmatprep.subr.bf16.mxu0 %v1959_v12 }
 0x363   :  { %1440 = vmatpush3.bf16.msra.mxu0 %v1543_v14  ;;  %v1551_v14 = vld [vmem:[#allocation21 + $0x38] sm:$0xff]  }
 0x364   :  { %1452 = vmatprep.subr.bf16.mxu0 %v1959_v12 }
 0x419   :  { %v1404_v61 = vpop.f32.mrb[2].mxu0 }
 0x41a   :  { %v565_v63 = vadd.f32 %v1404_v61, %v563_v60  ;;  %v550_v0 = vpop.f32.mrb[3].mxu0  ;;  %v723_v60 = vrot.slane %v2340_v16, %v722_v55 }
 0x41b   :  { %v564_v1 = vadd.f32 %v562_v62, %v550_v0 }
 0x41d   :  { %v566_v2 = vpack.c.bf16 %v565_v63, %v564_v1 }
 0x41f   :  { %1422 = vmatmul.mubr.bf16.vlgmr.msra.gmra.mrb[8].mxu1 %v566_v2 }
 0x420   :  { %1501 = vmatpush3.bf16.msra.mxu1 %v2282_v24  ;;  %1449 = vmatprep.mubr.msk.f32.mxu1 %vm1961_vm4, %v1959_v12 }
 0x421   :  { %1472 = vmatprep.subr.bf16.mxu1 %v1959_v12 }
 0x427   :  { %1450 = vmatmul.mubr.msk.f32.vlgmr.msra.gmra.mrb[6].mxu1 %vm384_vm6, %v263_v5 }
 0x428   :  { %1488 = vmatprep.mubr.msk.bf16.mxu1 %vm1961_vm4, %v1959_v12 }
 0x4f2   :  { %v669_v18 = vpop.f32.mrb[8].mxu1 }
 0x4f3   :  { %v670_v19 = vadd.f32 %v669_v18, %v586_v17  ;;  %v1423_v20 = vpop.f32.mrb[9].mxu1  ;;  %v1552_v18 = vld [vmem:[#allocation23] sm:$0xff]  }
 0x4f4   :  { %v672_v22 = vpop.f32.mrb[10].mxu1  ;;  %1473 = vmatpush3.bf16.msra.mxu1 %v1552_v18  ;;  %v1554_v20 = vld [vmem:[#allocation23 + $0x10] sm:$0xff]  }
 0x4f5   :  { %v686_v23 = vmul.f32 %v2345_v21, %v670_v19  ;;  %v673_v24 = vadd.f32 %v672_v22, %v586_v17  ;;  %v1424_v25 = vpop.f32.mrb[11].mxu1  ;;  %1474 = vmatprep.subr.bf16.mxu1 %v1959_v12  ;;  %v1556_v22 = vld [vmem:[#allocation23 + $0x20] sm:$0xff]  }
 0x4f6   :  { %v1559_v25 = vld [vmem:[#allocation23 + $0x38] sm:$0xff]  }
 0x4f7   :  { %v687_v27 = vmul.f32 %v2348_v26, %v673_v24  ;;  %v695_v28 = vmul.f32 %v686_v23, %v686_v23 }
 0x4f9   :  { %v688_v29 = vadd.f32 %v687_v27, %v686_v23  ;;  %v696_v31 = vmul.f32 %v687_v27, %v687_v27  ;;  %v1557_v23 = vld [vmem:[#allocation23 + $0x28] sm:$0xff]   ;;  %v747_v27 = vsub.s32 3, %v2298_v30 }
 0x4fa   :  { %v954_v32 = vpop.f32.mrb[6].mxu1 }
 0x4fb   :  { %v689_v33 = vrot.slane %v688_v29, 4  ;;  %v697_v34 = vadd.f32 %v696_v31, %v695_v28  ;;  %v1451_v35 = vpop.f32.mrb[7].mxu1  ;;  %v955_v13 = vadd.f32 %v954_v32, %v2265_v4  ;;  %v1555_v4 = vld [vmem:[#allocation23 + $0x18] sm:$0xff]   ;;  %v748_v28 = vrot.slane %v2340_v16, %v747_v27 }
 0x4fd   :  { %v690_v36 = vadd.f32 %v689_v33, %v688_v29  ;;  %v698_v37 = vrot.slane %v697_v34, 4  ;;  %v958_v17 = vpack.c.bf16 %v955_v13, %v955_v13 }
 0x4ff   :  { %v691_v38 = vrot.slane %v690_v36, 2  ;;  %v699_v39 = vadd.f32 %v698_v37, %v697_v34 }
 0x501   :  { %v692_v40 = vadd.f32 %v691_v38, %v690_v36  ;;  %v700_v41 = vrot.slane %v699_v39, 2 }
 0x503   :  { %v693_v42 = vrot.slane %v692_v40, 1  ;;  %v701_v43 = vadd.f32 %v700_v41, %v699_v39 }
 0x505   :  { %v694_v44 = vadd.f32 %v693_v42, %v692_v40  ;;  %v702_v45 = vrot.slane %v701_v43, 1 }
 0x507   :  { %v703_v46 = vadd.f32 %v702_v45, %v701_v43  ;;  %v704_v47 = vmul.f32 0.083333336, %v694_v44 }
 0x509   :  { %v705_v48 = vmul.f32 0.083333336, %v703_v46  ;;  %v706_v49 = vmul.f32 %v704_v47, %v704_v47  ;;  %v708_v50 = vsub.f32 %v670_v19, %v704_v47  ;;  %v709_v51 = vsub.f32 %v673_v24, %v704_v47  ;;  %v1553_v19 = vld [vmem:[#allocation23 + $0x8] sm:$0xff]   ;;  %v1558_v24 = vld [vmem:[#allocation23 + $0x30] sm:$0xff]  }
 0x50a   :  { %1475 = vmatpush3.bf16.msra.mxu1 %v1553_v19 }
 0x50b   :  { %v707_v52 = vsub.f32 %v705_v48, %v706_v49  ;;  %1476 = vmatprep.subr.bf16.mxu1 %v1959_v12 }
 0x50d   :  { %v710_v53 = vadd.f32 1e-05, %v707_v52 }
 0x50e   :  { %1477 = vmatpush3.bf16.msra.mxu1 %v1554_v20 }
 0x50f   :  { %1560 = vrsqrt.f32 %v710_v53  ;;  %1478 = vmatprep.subr.bf16.mxu1 %v1959_v12 }
 0x512   :  { %1479 = vmatpush3.bf16.msra.mxu1 %v1555_v4 }
 0x513   :  { %1480 = vmatprep.subr.bf16.mxu1 %v1959_v12 }
 0x516   :  { %1481 = vmatpush3.bf16.msra.mxu1 %v1556_v22 }
 0x517   :  { %1482 = vmatprep.subr.bf16.mxu1 %v1959_v12 }
 0x519   :  { %v1561_v57 = vpop.eup %1560 }
 0x51a   :  { %v712_v58 = vmul.f32 %v1561_v57, %v708_v50  ;;  %v713_v59 = vmul.f32 %v1561_v57, %v709_v51  ;;  %1483 = vmatpush3.bf16.msra.mxu1 %v1557_v23 }
 0x51b   :  { %1484 = vmatprep.subr.bf16.mxu1 %v1959_v12 }
 0x51c   :  { %v718_v61 = vmul.f32 %v717_v56, %v712_v58  ;;  %v719_v62 = vmul.f32 %v717_v56, %v713_v59 }
 0x51e   :  { %v725_v63 = vadd.f32 %v723_v60, %v719_v62  ;;  %v724_v0 = vadd.f32 %v723_v60, %v718_v61  ;;  %1485 = vmatpush3.bf16.msra.mxu1 %v1558_v24  ;;  %v2382_v61 = vld [vmem:[#allocation24] sm:$0x3f] }
 0x51f   :  { %1486 = vmatprep.subr.bf16.mxu1 %v1959_v12 }
 0x520   :  { %v727_v1 = vmax.f32 %v725_v63, 0.0  ;;  %v726_v2 = vmax.f32 %v724_v0, 0.0  ;;  %v978_v63 = vrot.slane %v2382_v61, %v585_v15 }
 0x522   :  { %v728_v5 = vpack.c.bf16 %v727_v1, %v726_v2  ;;  %1487 = vmatpush3.bf16.msra.mxu1 %v1559_v25 }
 0x524   :  { %1442 = vmatmul.mubr.bf16.vlgmr.msra.gmra.mrb[4].mxu0 %v728_v5 }
 0x525   :  { %1453 = vmatpush3.bf16.msra.mxu0 %v1544_v3  ;;  %1468 = vmatprep.mubr.msk.bf16.mxu0 %vm1961_vm4, %v1959_v12  ;;  %v868_v3 = vsub.s32 4, %v2298_v30 }
 0x526   :  { %1454 = vmatprep.subr.bf16.mxu0 %v1959_v12 }
 0x527   :  { %v869_v13 = vrot.slane %v2340_v16, %v868_v3 }
 0x529   :  { %1455 = vmatpush3.bf16.msra.mxu0 %v1545_v6 }
 0x52a   :  { %1456 = vmatprep.subr.bf16.mxu0 %v1959_v12 }
 0x52d   :  { %1457 = vmatpush3.bf16.msra.mxu0 %v1546_v7 }
 0x52e   :  { %1458 = vmatprep.subr.bf16.mxu0 %v1959_v12 }
 0x531   :  { %1459 = vmatpush3.bf16.msra.mxu0 %v1547_v8 }
 0x532   :  { %1460 = vmatprep.subr.bf16.mxu0 %v1959_v12 }
 0x535   :  { %1461 = vmatpush3.bf16.msra.mxu0 %v1548_v9  ;;  %v874_v9 = vsub.s32 5, %v2298_v30 }
 0x536   :  { %1462 = vmatprep.subr.bf16.mxu0 %v1959_v12 }
 0x537   :  { %v875_v18 = vrot.slane %v2340_v16, %v874_v9 }
 0x539   :  { %1463 = vmatpush3.bf16.msra.mxu0 %v1549_v10 }
 0x53a   :  { %1464 = vmatprep.subr.bf16.mxu0 %v1959_v12 }
 0x53d   :  { %1465 = vmatpush3.bf16.msra.mxu0 %v1550_v11 }
 0x53e   :  { %1466 = vmatprep.subr.bf16.mxu0 %v1959_v12 }
 0x541   :  { %1467 = vmatpush3.bf16.msra.mxu0 %v1551_v14 }
 0x544   :  { %1469 = vmatmul.mubr.bf16.vlgmr.msra.gmra.mrb[8].mxu0 %v958_v17 }
 0x5f7   :  { %v831_v29 = vpop.f32.mrb[4].mxu0 }
 0x5f8   :  { %v832_v31 = vadd.f32 %v831_v29, %v748_v28  ;;  %v1443_v32 = vpop.f32.mrb[5].mxu0 }
 0x5f9   :  { %v834_v33 = vpop.f32.mrb[6].mxu0 }
 0x5fa   :  { %v838_v34 = vmul.f32 %v832_v31, %v2345_v21  ;;  %v835_v35 = vadd.f32 %v834_v33, %v748_v28  ;;  %v1444_v36 = vpop.f32.mrb[7].mxu0 }
 0x5fc   :  { %v839_v37 = vmul.f32 %v835_v35, %v2348_v26  ;;  %v847_v38 = vmul.f32 %v838_v34, %v838_v34 }
 0x5fe   :  { %v840_v39 = vadd.f32 %v839_v37, %v838_v34  ;;  %v848_v12 = vmul.f32 %v839_v37, %v839_v37 }
 0x600   :  { %v841_v40 = vrot.slane %v840_v39, 4  ;;  %v849_v41 = vadd.f32 %v848_v12, %v847_v38 }
 0x602   :  { %v842_v42 = vadd.f32 %v841_v40, %v840_v39  ;;  %v850_v43 = vrot.slane %v849_v41, 4 }
 0x604   :  { %v843_v44 = vrot.slane %v842_v42, 2  ;;  %v851_v45 = vadd.f32 %v850_v43, %v849_v41 }
 0x606   :  { %v844_v46 = vadd.f32 %v843_v44, %v842_v42  ;;  %v852_v47 = vrot.slane %v851_v45, 2 }
 0x608   :  { %v845_v48 = vrot.slane %v844_v46, 1  ;;  %v853_v49 = vadd.f32 %v852_v47, %v851_v45  ;;  %v1093_v45 = vrot.slane %v2382_v61, %v716_v54 }
 0x60a   :  { %v846_v50 = vadd.f32 %v845_v48, %v844_v46  ;;  %v854_v51 = vrot.slane %v853_v49, 1 }
 0x60c   :  { %v855_v52 = vadd.f32 %v854_v51, %v853_v49  ;;  %v856_v53 = vmul.f32 0.083333336, %v846_v50 }
 0x60e   :  { %v857_v56 = vmul.f32 0.083333336, %v855_v52  ;;  %v858_v57 = vmul.f32 %v856_v53, %v856_v53  ;;  %v860_v58 = vsub.f32 %v832_v31, %v856_v53  ;;  %v861_v59 = vsub.f32 %v835_v35, %v856_v53 }
 0x610   :  { %v859_v60 = vsub.f32 %v857_v56, %v858_v57 }
 0x612   :  { %v862_v62 = vadd.f32 1e-05, %v859_v60 }
 0x614   :  { %1562 = vrsqrt.f32 %v862_v62 }
 0x617   :  { %v1061_v0 = vpop.f32.mrb[8].mxu0 }
 0x618   :  { %v1062_v1 = vadd.f32 %v1061_v0, %v978_v63  ;;  %v1470_v2 = vpop.f32.mrb[9].mxu0 }
 0x619   :  { %v1064_v5 = vpop.f32.mrb[10].mxu0 }
 0x61a   :  { %v1067_v6 = vsel %vm300_vm0, %v1062_v1, 0.0  ;;  %v1074_v7 = vmul.f32 %v1062_v1, %v1062_v1  ;;  %v1471_v8 = vpop.f32.mrb[11].mxu0 }
 0x61b   :  { %v1068_v10 = vrot.slane %v1067_v6, 4 }
 0x61c   :  { %v1075_v11 = vsel %vm300_vm0, %v1074_v7, 0.0 }
 0x61d   :  { %v1069_v15 = vadd.f32 %v1068_v10, %v1067_v6  ;;  %v1076_v14 = vrot.slane %v1075_v11, 4 }
 0x61e   :  { %v1563_v17 = vpop.eup %1562 }
 0x61f   :  { %v865_v19 = vmul.f32 %v1563_v17, %v861_v59  ;;  %v1070_v20 = vrot.slane %v1069_v15, 2  ;;  %v1077_v4 = vadd.f32 %v1076_v14, %v1075_v11  ;;  %v864_v22 = vmul.f32 %v1563_v17, %v860_v58 }
 0x621   :  { %v871_v23 = vmul.f32 %v869_v13, %v865_v19  ;;  %v1071_v24 = vadd.f32 %v1070_v20, %v1069_v15  ;;  %v1078_v25 = vrot.slane %v1077_v4, 2  ;;  %v870_v28 = vmul.f32 %v869_v13, %v864_v22 }
 0x623   :  { %v1072_v29 = vrot.slane %v1071_v24, 1  ;;  %v1079_v31 = vadd.f32 %v1078_v25, %v1077_v4  ;;  %v876_v32 = vadd.f32 %v875_v18, %v870_v28  ;;  %v877_v33 = vadd.f32 %v875_v18, %v871_v23 }
 0x625   :  { %v1073_v34 = vadd.f32 %v1072_v29, %v1071_v24  ;;  %v1080_v35 = vrot.slane %v1079_v31, 1  ;;  %v878_v36 = vmax.f32 %v876_v32, 0.0  ;;  %v879_v37 = vmax.f32 %v877_v33, 0.0 }
 0x627   :  { %v1081_v38 = vadd.f32 %v1080_v35, %v1079_v31  ;;  %v1082_v39 = vmul.f32 0.5, %v1073_v34  ;;  %v880_v16 = vmul.f32 %v878_v36, %v2345_v21  ;;  %v881_v12 = vmul.f32 %v879_v37, %v2348_v26 }
 0x628   :  { %v1098_v21 = vrot.slane %v2382_v61, %v722_v55 }
 0x629   :  { %v1083_v40 = vmul.f32 0.5, %v1081_v38  ;;  %v1084_v41 = vmul.f32 %v1082_v39, %v1082_v39  ;;  %882 = vst [vmem:[#allocation26] sm:$0xff] %v880_v16  ;;  %883 = vst [vmem:[#allocation26 + $0x8] sm:$0xff] %v881_v12  ;;  %v1086_v44 = vsub.f32 %v1062_v1, %v1082_v39 }
 0x62b   :  { %v1085_v42 = vsub.f32 %v1083_v40, %v1084_v41 }
 0x62d   :  { %v1087_v43 = vadd.f32 1e-05, %v1085_v42 }
 0x62f   :  { %1564 = vrsqrt.f32 %v1087_v43 }
 0x639   :  { %v1565_v46 = vpop.eup %1564 }
 0x63a   :  { %v1089_v47 = vmul.f32 %v1565_v46, %v1086_v44 }
 0x63c   :  { %v1094_v48 = vmul.f32 %v1093_v45, %v1089_v47 }
 0x63e   :  { %v1099_v26 = vadd.f32 %v1098_v21, %v1094_v48 }
 0x640   :  { %v1100_v49 = vmax.f32 %v1099_v26, 0.0 }
 0x642   :  { %v1101_v50 = vpack.c.bf16 %v1100_v49, %v1100_v49 }
 0x644   :  { %1489 = vmatmul.mubr.bf16.vlgmr.msra.gmra.mrb[12].mxu1 %v1101_v50 }
 0x645   :  { %1887 = shalt.err (!%p1884_p4)
}
 0x646   :  { %s1888_s23 = scalar_lea.hbm %s2458_s15, 256 }
 0x647   :  { %p1889_p5 = scmp.ne.s32.totalorder %s2458_s15, %s1888_s23  ;;  %p1892_p6 = scmp.lt.u32.totalorder %s1888_s23, %s2458_s15 }
 0x649   :  { %p1894_p7 = pnand %p1892_p6, %p1889_p5 }
 0x64b   :  { %1897 = shalt.err (!%p1894_p7)
}
 0x64c   :  { %1256 = dma.vmem_to_hbm [thread:$0]  %s1251_s25, 256, %s2458_s15, [#allocation5], %s1943_s22, %s1943_s22, %s1944_s0   ;;  %v1121_v54 = vrot.slane %v2382_v61, %v747_v27  ;;  %v1236_v19 = vrot.slane %v2382_v61, %v868_v3  ;;  %v1241_v22 = vrot.slane %v2382_v61, %v874_v9 }
 0x64d   :  { %s1963_s15 = smov [#allocation27]  }
 0x64e   :  { %s1263_s22 = sshll.u32 %s1963_s15, 4  ;;  %s1264_s22 = int_to_ptr.vmem [resolvable:$true] %s1263_s22 }
 0x64f   :  { %s1898_s0 = scalar_lea.vmem %s1264_s22, 32  ;;  %p1903_p9 = scmp.lt.s32.totalorder %s1264_s22, %s1264_s22 }
 0x650   :  { %p1899_p8 = scmp.ne.s32.totalorder %s1264_s22, %s1898_s0  ;;  %p1904_p10 = scmp.lt.s32.totalorder %s1898_s0, %s1898_s0 }
 0x652   :  { %p1905_p11 = por %p1904_p10, %p1903_p9 }
 0x654   :  { %p1906_p12 = pnand %p1905_p11, %p1899_p8 }
 0x717   :  { %v1204_v55 = vpop.f32.mrb[12].mxu1 }
 0x718   :  { %v1205_v51 = vadd.f32 %v1204_v55, %v1121_v54  ;;  %v1490_v52 = vpop.f32.mrb[13].mxu1 }
 0x719   :  { %v1207_v53 = vpop.f32.mrb[14].mxu1 }
 0x71a   :  { %v1210_v56 = vsel %vm300_vm0, %v1205_v51, 0.0  ;;  %v1217_v57 = vmul.f32 %v1205_v51, %v1205_v51  ;;  %v1491_v58 = vpop.f32.mrb[15].mxu1 }
 0x71b   :  { %v1211_v59 = vrot.slane %v1210_v56, 4 }
 0x71c   :  { %v1218_v60 = vsel %vm300_vm0, %v1217_v57, 0.0 }
 0x71d   :  { %v1212_v62 = vadd.f32 %v1211_v59, %v1210_v56  ;;  %v1219_v63 = vrot.slane %v1218_v60, 4 }
 0x71f   :  { %v1213_v0 = vrot.slane %v1212_v62, 2  ;;  %v1220_v1 = vadd.f32 %v1219_v63, %v1218_v60 }
 0x721   :  { %v1214_v2 = vadd.f32 %v1213_v0, %v1212_v62  ;;  %v1221_v5 = vrot.slane %v1220_v1, 2 }
 0x723   :  { %v1215_v6 = vrot.slane %v1214_v2, 1  ;;  %v1222_v7 = vadd.f32 %v1221_v5, %v1220_v1 }
 0x725   :  { %v1216_v27 = vadd.f32 %v1215_v6, %v1214_v2  ;;  %v1223_v8 = vrot.slane %v1222_v7, 1 }
 0x727   :  { %v1224_v10 = vadd.f32 %v1223_v8, %v1222_v7  ;;  %v1225_v11 = vmul.f32 0.5, %v1216_v27 }
 0x729   :  { %v1226_v13 = vmul.f32 0.5, %v1224_v10  ;;  %v1227_v15 = vmul.f32 %v1225_v11, %v1225_v11  ;;  %v1229_v18 = vsub.f32 %v1205_v51, %v1225_v11 }
 0x72b   :  { %v1228_v14 = vsub.f32 %v1226_v13, %v1227_v15 }
 0x72d   :  { %v1230_v17 = vadd.f32 1e-05, %v1228_v14 }
 0x72f   :  { %1566 = vrsqrt.f32 %v1230_v17 }
 0x739   :  { %v1567_v20 = vpop.eup %1566 }
 0x73a   :  { %v1232_v4 = vmul.f32 %v1567_v20, %v1229_v18 }
 0x73c   :  { %v1237_v23 = vmul.f32 %v1236_v19, %v1232_v4 }
 0x73e   :  { %v1242_v24 = vadd.f32 %v1241_v22, %v1237_v23 }
 0x740   :  { %v1243_v25 = vmax.f32 %v1242_v24, 0.0 }
 0x742   :  { %1244 = vst [vmem:[#allocation27] sm:$0x3] %v1243_v25 }
 0x743   :  { %1909 = shalt.err (!%p1906_p12)
}
 0x744   :  { %s1910_s20 = scalar_lea.hbm %s2459_s16, 32 }
 0x745   :  { %p1911_p13 = scmp.ne.s32.totalorder %s2459_s16, %s1910_s20  ;;  %p1914_p0 = scmp.lt.u32.totalorder %s1910_s20, %s2459_s16 }
 0x747   :  { %p1916_p1 = pnand %p1914_p0, %p1911_p13 }
 0x749   :  { %1919 = shalt.err (!%p1916_p1)
}
 0x74a   :  { %1266 = dma.vmem_to_hbm [thread:$0]  %s1264_s22, 32, %s2459_s16, [#allocation28]  }
 0x74b   :  { %1936 = dma.done.wait [#allocation5], 256  }
 0x74c   :  { %1937 = vsyncadd [#allocation5], 4294967040 }
 0x74d   :  { %1938 = dma.done.wait [#allocation28], 32  }
 0x74e   :  { %1939 = vsyncadd [#allocation28], 4294967264 }
 0x74f   :  { %1273 = vsyncpa [#allocation4], 1 }
 0x750   :  { %1274 = vsyncpa [#allocation7], 1 }
 0x751   :  { %1275 = vsyncpa [#allocation10], 1 }
 0x752   :  { %1276 = vsyncpa [#allocation13], 1 }
 0x753   :  { %1277 = vsyncpa [#allocation16], 1 }
 0x754   :  { %1278 = vsyncpa [#allocation19], 1 }
 0x755   :  { %1279 = vsyncpa [#allocation22], 1 }
 0x756   :  { %1280 = vsyncpa [#allocation25], 1 }
 0x757   :  { %1281 = vsyncpa [#allocation5], 1 }
 0x758   :  { %1282 = vsyncpa [#allocation28], 1 }

</bundles_post_ra>
